<compile_context>
chip_gen: v6e
topology: v6e:2x2x1
jax: 0.10.0
libtpu: 0.0.40
codegen_flags: <defaults>
</compile_context>

<pallas_src>
import jax
import jax.numpy as jnp
from jax.experimental import pallas as pl
from jax.experimental.pallas import tpu as pltpu


# ---------------------------------------------------------------------------
# Network geometry (fixed by the PyTorch module + 32x32 input)
# ---------------------------------------------------------------------------
H0, C0 = 32, 3            # input spatial / channels (kernel works in (H, W*C))
K = 5                     # conv kernel size
C1, C2 = 6, 16            # conv1 / conv2 output channels
OH1 = H0 - K + 1          # 28
PH1 = OH1 // 2            # 14
OH2 = PH1 - K + 1         # 10
PH2 = OH2 // 2            # 5
HALF1 = (OH1 // 2) * C1   # 84  : width of one W-pool half for conv1 stage
HALF2 = (OH2 // 2) * C2   # 80
NCOL1 = 128 + HALF1       # 212 : odd-ow block starts at lane 128 (aligned)
NCOL2 = 128 + HALF2       # 208
FC1, FC2, FC3 = 120, 84, 10


# ---------------------------------------------------------------------------
# The fused kernel (one grid step == one batch element)
# ---------------------------------------------------------------------------
def _lenet_kernel(x_ref, w1_ref, b1_ref, sel1_ref, w2_ref, b2_ref, sel2_ref,
                  f1w_ref, f1b_ref, f2w_ref, f2b_ref, f3w_ref, f3b_ref,
                  o_ref, p1_ref, p2_ref):
    f32 = jnp.float32

    def pool_rows(y, sel_ref):
        # Exact 2x2-in-H max pool: pick even/odd rows with precomputed 0/1
        # matrices (runs on the MXU, keeps the VPU/XLU free).
        even = jnp.dot(sel_ref[0], y, preferred_element_type=f32)
        odd = jnp.dot(sel_ref[1], y, preferred_element_type=f32)
        return jnp.maximum(even, odd)

    # ---- conv1 + bias + relu: 5 banded matmuls over the kernel-row shifts ----
    acc = jnp.dot(x_ref[0, 0:OH1, :], w1_ref[0], preferred_element_type=f32)
    for i in range(1, K):
        acc = acc + jnp.dot(x_ref[0, i:i + OH1, :], w1_ref[i],
                            preferred_element_type=f32)
    y1 = jnp.maximum(acc + b1_ref[...], 0.0)                    # (28, 212)

    # ---- 2x2 max pool #1 ----
    y1 = jnp.maximum(y1[:, 0:HALF1], y1[:, 128:128 + HALF1])    # W-pool (28, 84)
    p1_ref[...] = pool_rows(y1, sel1_ref)                       # H-pool (14, 84)

    # ---- conv2 + bias + relu ----
    acc = jnp.dot(p1_ref[0:OH2, :], w2_ref[0], preferred_element_type=f32)
    for i in range(1, K):
        acc = acc + jnp.dot(p1_ref[i:i + OH2, :], w2_ref[i],
                            preferred_element_type=f32)
    y2 = jnp.maximum(acc + b2_ref[...], 0.0)                    # (10, 208)

    # ---- 2x2 max pool #2 ----
    y2 = jnp.maximum(y2[:, 0:HALF2], y2[:, 128:128 + HALF2])    # (10, 80)
    p2_ref[...] = pool_rows(y2, sel2_ref)                       # (5, 80)

    # ---- fc1 + relu: contraction over 400 features split into 5 blocks of 80
    z = jnp.dot(p2_ref[0:1, :], f1w_ref[0], preferred_element_type=f32)
    for h in range(1, PH2):
        z = z + jnp.dot(p2_ref[h:h + 1, :], f1w_ref[h],
                        preferred_element_type=f32)
    z = jnp.maximum(z + f1b_ref[...], 0.0)                      # (1, 120)

    # ---- fc2 + relu, fc3 ----
    z = jnp.maximum(jnp.dot(z, f2w_ref[...], preferred_element_type=f32)
                    + f2b_ref[...], 0.0)                        # (1, 84)
    z = jnp.dot(z, f3w_ref[...], preferred_element_type=f32) + f3b_ref[...]
    o_ref[0, :, :] = z                                          # (1, 10)


# ---------------------------------------------------------------------------
# One-time weight re-layout (done once, outside the jitted forward)
# ---------------------------------------------------------------------------
def _banded_conv_weight(w, in_hw, cin):
    """Torch conv weight (Cout, Cin, K, K) -> (K, in_hw*Cin, 128 + OW/2*Cout).

    Row r encodes the input column (w_in, c_in) as r = w_in*Cin + c_in.
    Output col = pw*128 + ow_half*Cout + co encodes ow = 2*ow_half + pw, so the
    W-direction of the 2x2 pool is a max over the two 128-aligned lane blocks.
    """
    cout, cin_w, k, _ = w.shape
    assert cin_w == cin
    ow_total = in_hw - k + 1
    half = (ow_total // 2) * cout
    ncol = 128 + half

    rin = jnp.arange(in_hw * cin)
    w_in = rin // cin
    c_in = rin % cin

    col = jnp.arange(ncol)
    pw = col // 128
    rem = col % 128
    owh = rem // cout
    co = rem % cout
    ow = 2 * owh + pw
    col_ok = rem < half

    dw = w_in[:, None] - ow[None, :]                 # (rows, cols)
    valid = col_ok[None, :] & (dw >= 0) & (dw < k)
    dw_c = jnp.clip(dw, 0, k - 1)

    bands = []
    for i in range(k):
        vals = w[co[None, :], c_in[:, None], i, dw_c]     # (rows, cols)
        bands.append(jnp.where(valid, vals, 0.0))
    return jnp.stack(bands, axis=0).astype(jnp.float32)


def _banded_bias(bias, ow_total):
    cout = bias.shape[0]
    half = (ow_total // 2) * cout
    ncol = 128 + half
    rem = jnp.arange(ncol) % 128
    band = jnp.where(rem < half, bias[rem % cout], 0.0)
    return band.reshape(1, ncol).astype(jnp.float32)


def _pool_select(n_out):
    """(2, n_out, 2*n_out) 0/1 matrices selecting even / odd rows."""
    n_in = 2 * n_out
    r = jnp.arange(n_out)[:, None]
    c = jnp.arange(n_in)[None, :]
    sel_e = (c == 2 * r).astype(jnp.float32)
    sel_o = (c == 2 * r + 1).astype(jnp.float32)
    return jnp.stack([sel_e, sel_o], axis=0)


def _fc1_blocks(fc1_w):
    """(120, 400) torch fc1 weight -> (5, 80, 120) blocks matching the kernel's
    pooled-conv2 layout p2[h, w*16 + c] (torch flattens NCHW as (c, h, w))."""
    k = jnp.arange(PH2 * C2)                 # 0..79, k = w*16 + c
    w_ = k // C2
    c_ = k % C2
    h_ = jnp.arange(PH2)
    f = c_[None, :] * (PH2 * PH2) + h_[:, None] * PH2 + w_[None, :]   # (5, 80)
    return fc1_w.T[f, :].astype(jnp.float32)                           # (5, 80, 120)


def prepare_params(params):
    return {
        "w1": _banded_conv_weight(params["conv1_w"], H0, C0),   # (5, 96, 212)
        "b1": _banded_bias(params["conv1_b"], OH1),              # (1, 212)
        "sel1": _pool_select(PH1),                               # (2, 14, 28)
        "w2": _banded_conv_weight(params["conv2_w"], PH1, C1),   # (5, 84, 208)
        "b2": _banded_bias(params["conv2_b"], OH2),              # (1, 208)
        "sel2": _pool_select(PH2),                               # (2, 5, 10)
        "f1w": _fc1_blocks(params["fc1_w"]),                     # (5, 80, 120)
        "f1b": params["fc1_b"].reshape(1, FC1).astype(jnp.float32),
        "f2w": params["fc2_w"].T.astype(jnp.float32),            # (120, 84)
        "f2b": params["fc2_b"].reshape(1, FC2).astype(jnp.float32),
        "f3w": params["fc3_w"].T.astype(jnp.float32),            # (84, 10)
        "f3b": params["fc3_b"].reshape(1, FC3).astype(jnp.float32),
    }


# ---------------------------------------------------------------------------
# Forward pass (semantics of Net.forward) — one kernel launch
# ---------------------------------------------------------------------------
def net_forward(prep, x_nchw):
    B = x_nchw.shape[0]
    # NCHW -> (B, H, W*C): one tiny XLA transpose; the rest is in-kernel.
    x = jnp.transpose(x_nchw, (0, 2, 3, 1)).reshape(B, H0, H0 * C0)

    def full_spec(a):
        zeros = (0,) * a.ndim
        return pl.BlockSpec(a.shape, lambda b, _z=zeros: _z)

    weights = (prep["w1"], prep["b1"], prep["sel1"],
               prep["w2"], prep["b2"], prep["sel2"],
               prep["f1w"], prep["f1b"], prep["f2w"], prep["f2b"],
               prep["f3w"], prep["f3b"])

    out = pl.pallas_call(
        _lenet_kernel,
        out_shape=jax.ShapeDtypeStruct((B, 1, FC3), jnp.float32),
        grid_spec=pltpu.PrefetchScalarGridSpec(
            num_scalar_prefetch=0,
            grid=(B,),
            in_specs=[pl.BlockSpec((1, H0, H0 * C0), lambda b: (b, 0, 0))]
                     + [full_spec(a) for a in weights],
            out_specs=pl.BlockSpec((1, 1, FC3), lambda b: (b, 0, 0)),
            scratch_shapes=[
                pltpu.VMEM((PH1, HALF1), jnp.float32),   # pooled conv1 (14, 84)
                pltpu.VMEM((PH2, HALF2), jnp.float32),   # pooled conv2 (5, 80)
            ],
        ),
        compiler_params=pltpu.CompilerParams(
            dimension_semantics=("parallel",)),
    )(x, *weights)
    return out.reshape(B, FC3)


# ---------------------------------------------------------------------------
# Parameters (deterministic, PyTorch-style uniform(-1/sqrt(fan_in), ...))
# ---------------------------------------------------------------------------
def init_params(key):
    ks = jax.random.split(key, 10)

    def u(k, shape, fan_in):
        bound = 1.0 / jnp.sqrt(jnp.float32(fan_in))
        return jax.random.uniform(k, shape, jnp.float32, -bound, bound)

    return {
        "conv1_w": u(ks[0], (6, 3, 5, 5), 3 * 5 * 5),
        "conv1_b": u(ks[1], (6,), 3 * 5 * 5),
        "conv2_w": u(ks[2], (16, 6, 5, 5), 6 * 5 * 5),
        "conv2_b": u(ks[3], (16,), 6 * 5 * 5),
        "fc1_w": u(ks[4], (120, 16 * 5 * 5), 16 * 5 * 5),
        "fc1_b": u(ks[5], (120,), 16 * 5 * 5),
        "fc2_w": u(ks[6], (84, 120), 120),
        "fc2_b": u(ks[7], (84,), 120),
        "fc3_w": u(ks[8], (10, 84), 84),
        "fc3_b": u(ks[9], (10,), 84),
    }


if __name__ == "__main__":
    key = jax.random.PRNGKey(0)
    pkey, xkey = jax.random.split(key)
    params = init_params(pkey)
    prep = prepare_params(params)          # one-time weight re-layout
    # conv/pool geometry implies 32x32 spatial input (16*5*5 flatten size)
    x = jax.random.normal(xkey, (2, 3, 32, 32), dtype=jnp.float32)

    out = jax.jit(net_forward)(prep, x)
    out = jax.block_until_ready(out)

    assert out.shape == (2, 10), out.shape
    assert out.dtype == jnp.float32
    assert bool(jnp.all(jnp.isfinite(out)))
    print("KERNEL_OK")
</pallas_src>

<mosaic_0001>
module attributes {stable_mosaic.version = 11 : i64} {
  func.func @_lenet_kernel(%arg0: i32, %arg1: memref<1x32x96xf32, #tpu.memory_space<vmem>>, %arg2: memref<5x96x212xf32, #tpu.memory_space<vmem>>, %arg3: memref<1x212xf32, #tpu.memory_space<vmem>>, %arg4: memref<2x14x28xf32, #tpu.memory_space<vmem>>, %arg5: memref<5x84x208xf32, #tpu.memory_space<vmem>>, %arg6: memref<1x208xf32, #tpu.memory_space<vmem>>, %arg7: memref<2x5x10xf32, #tpu.memory_space<vmem>>, %arg8: memref<5x80x120xf32, #tpu.memory_space<vmem>>, %arg9: memref<1x120xf32, #tpu.memory_space<vmem>>, %arg10: memref<120x84xf32, #tpu.memory_space<vmem>>, %arg11: memref<1x84xf32, #tpu.memory_space<vmem>>, %arg12: memref<84x10xf32, #tpu.memory_space<vmem>>, %arg13: memref<1x10xf32, #tpu.memory_space<vmem>>, %arg14: memref<1x1x10xf32, #tpu.memory_space<vmem>>, %arg15: memref<14x84xf32, #tpu.memory_space<vmem>>, %arg16: memref<5x80xf32, #tpu.memory_space<vmem>>) attributes {dimension_semantics = [#tpu.dimension_semantics<parallel>], iteration_bounds = array<i64: 2>, scalar_prefetch = 0 : i64, scratch_operands = 2 : i64, tpu.core_type = #tpu.core_type<tc>, window_params = [{transform_indices = @transform_0, window_bounds = array<i64: 1, 32, 96>}, {pipeline_mode = #tpu.pipeline_mode<synchronous>, transform_indices = @transform_1, window_bounds = array<i64: 5, 96, 212>}, {pipeline_mode = #tpu.pipeline_mode<synchronous>, transform_indices = @transform_2, window_bounds = array<i64: 1, 212>}, {pipeline_mode = #tpu.pipeline_mode<synchronous>, transform_indices = @transform_3, window_bounds = array<i64: 2, 14, 28>}, {pipeline_mode = #tpu.pipeline_mode<synchronous>, transform_indices = @transform_4, window_bounds = array<i64: 5, 84, 208>}, {pipeline_mode = #tpu.pipeline_mode<synchronous>, transform_indices = @transform_5, window_bounds = array<i64: 1, 208>}, {pipeline_mode = #tpu.pipeline_mode<synchronous>, transform_indices = @transform_6, window_bounds = array<i64: 2, 5, 10>}, {pipeline_mode = #tpu.pipeline_mode<synchronous>, transform_indices = @transform_7, window_bounds = array<i64: 5, 80, 120>}, {pipeline_mode = #tpu.pipeline_mode<synchronous>, transform_indices = @transform_8, window_bounds = array<i64: 1, 120>}, {pipeline_mode = #tpu.pipeline_mode<synchronous>, transform_indices = @transform_9, window_bounds = array<i64: 120, 84>}, {pipeline_mode = #tpu.pipeline_mode<synchronous>, transform_indices = @transform_10, window_bounds = array<i64: 1, 84>}, {pipeline_mode = #tpu.pipeline_mode<synchronous>, transform_indices = @transform_11, window_bounds = array<i64: 84, 10>}, {pipeline_mode = #tpu.pipeline_mode<synchronous>, transform_indices = @transform_12, window_bounds = array<i64: 1, 10>}, {transform_indices = @transform_13, window_bounds = array<i64: 1, 1, 10>}]} {
    %c0 = arith.constant 0 : index
    %c0_0 = arith.constant 0 : index
    %c0_1 = arith.constant 0 : index
    %0 = vector.load %arg1[%c0, %c0_0, %c0_1] : memref<1x32x96xf32, #tpu.memory_space<vmem>>, vector<1x28x96xf32>
    %1 = vector.shape_cast %0 : vector<1x28x96xf32> to vector<28x96xf32>
    %c0_2 = arith.constant 0 : index
    %c0_3 = arith.constant 0 : index
    %c0_4 = arith.constant 0 : index
    %2 = vector.load %arg2[%c0_2, %c0_3, %c0_4] : memref<5x96x212xf32, #tpu.memory_space<vmem>>, vector<1x96x212xf32>
    %3 = vector.shape_cast %2 : vector<1x96x212xf32> to vector<96x212xf32>
    %cst = arith.constant dense<0.000000e+00> : vector<28x212xf32>
    %4 = tpu.matmul %1, %3, %cst {dimension_numbers = #tpu.dot_dimension_numbers<[1], [0], [0], [1], [0, 0, 1, 1], [], []>} : vector<28x96xf32>, vector<96x212xf32>, vector<28x212xf32> -> vector<28x212xf32>
    %c0_5 = arith.constant 0 : index
    %c1 = arith.constant 1 : index
    %c0_6 = arith.constant 0 : index
    %5 = vector.load %arg1[%c0_5, %c1, %c0_6] : memref<1x32x96xf32, #tpu.memory_space<vmem>>, vector<1x28x96xf32>
    %6 = vector.shape_cast %5 : vector<1x28x96xf32> to vector<28x96xf32>
    %c1_7 = arith.constant 1 : index
    %c0_8 = arith.constant 0 : index
    %c0_9 = arith.constant 0 : index
    %7 = vector.load %arg2[%c1_7, %c0_8, %c0_9] : memref<5x96x212xf32, #tpu.memory_space<vmem>>, vector<1x96x212xf32>
    %8 = vector.shape_cast %7 : vector<1x96x212xf32> to vector<96x212xf32>
    %cst_10 = arith.constant dense<0.000000e+00> : vector<28x212xf32>
    %9 = tpu.matmul %6, %8, %cst_10 {dimension_numbers = #tpu.dot_dimension_numbers<[1], [0], [0], [1], [0, 0, 1, 1], [], []>} : vector<28x96xf32>, vector<96x212xf32>, vector<28x212xf32> -> vector<28x212xf32>
    %10 = arith.addf %4, %9 : vector<28x212xf32>
    %c0_11 = arith.constant 0 : index
    %c2 = arith.constant 2 : index
    %c0_12 = arith.constant 0 : index
    %11 = vector.load %arg1[%c0_11, %c2, %c0_12] : memref<1x32x96xf32, #tpu.memory_space<vmem>>, vector<1x28x96xf32>
    %12 = vector.shape_cast %11 : vector<1x28x96xf32> to vector<28x96xf32>
    %c2_13 = arith.constant 2 : index
    %c0_14 = arith.constant 0 : index
    %c0_15 = arith.constant 0 : index
    %13 = vector.load %arg2[%c2_13, %c0_14, %c0_15] : memref<5x96x212xf32, #tpu.memory_space<vmem>>, vector<1x96x212xf32>
    %14 = vector.shape_cast %13 : vector<1x96x212xf32> to vector<96x212xf32>
    %cst_16 = arith.constant dense<0.000000e+00> : vector<28x212xf32>
    %15 = tpu.matmul %12, %14, %cst_16 {dimension_numbers = #tpu.dot_dimension_numbers<[1], [0], [0], [1], [0, 0, 1, 1], [], []>} : vector<28x96xf32>, vector<96x212xf32>, vector<28x212xf32> -> vector<28x212xf32>
    %16 = arith.addf %10, %15 : vector<28x212xf32>
    %c0_17 = arith.constant 0 : index
    %c3 = arith.constant 3 : index
    %c0_18 = arith.constant 0 : index
    %17 = vector.load %arg1[%c0_17, %c3, %c0_18] : memref<1x32x96xf32, #tpu.memory_space<vmem>>, vector<1x28x96xf32>
    %18 = vector.shape_cast %17 : vector<1x28x96xf32> to vector<28x96xf32>
    %c3_19 = arith.constant 3 : index
    %c0_20 = arith.constant 0 : index
    %c0_21 = arith.constant 0 : index
    %19 = vector.load %arg2[%c3_19, %c0_20, %c0_21] : memref<5x96x212xf32, #tpu.memory_space<vmem>>, vector<1x96x212xf32>
    %20 = vector.shape_cast %19 : vector<1x96x212xf32> to vector<96x212xf32>
    %cst_22 = arith.constant dense<0.000000e+00> : vector<28x212xf32>
    %21 = tpu.matmul %18, %20, %cst_22 {dimension_numbers = #tpu.dot_dimension_numbers<[1], [0], [0], [1], [0, 0, 1, 1], [], []>} : vector<28x96xf32>, vector<96x212xf32>, vector<28x212xf32> -> vector<28x212xf32>
    %22 = arith.addf %16, %21 : vector<28x212xf32>
    %c0_23 = arith.constant 0 : index
    %c4 = arith.constant 4 : index
    %c0_24 = arith.constant 0 : index
    %23 = vector.load %arg1[%c0_23, %c4, %c0_24] : memref<1x32x96xf32, #tpu.memory_space<vmem>>, vector<1x28x96xf32>
    %24 = vector.shape_cast %23 : vector<1x28x96xf32> to vector<28x96xf32>
    %c4_25 = arith.constant 4 : index
    %c0_26 = arith.constant 0 : index
    %c0_27 = arith.constant 0 : index
    %25 = vector.load %arg2[%c4_25, %c0_26, %c0_27] : memref<5x96x212xf32, #tpu.memory_space<vmem>>, vector<1x96x212xf32>
    %26 = vector.shape_cast %25 : vector<1x96x212xf32> to vector<96x212xf32>
    %cst_28 = arith.constant dense<0.000000e+00> : vector<28x212xf32>
    %27 = tpu.matmul %24, %26, %cst_28 {dimension_numbers = #tpu.dot_dimension_numbers<[1], [0], [0], [1], [0, 0, 1, 1], [], []>} : vector<28x96xf32>, vector<96x212xf32>, vector<28x212xf32> -> vector<28x212xf32>
    %28 = arith.addf %22, %27 : vector<28x212xf32>
    %c0_29 = arith.constant 0 : index
    %c0_30 = arith.constant 0 : index
    %29 = vector.load %arg3[%c0_29, %c0_30] : memref<1x212xf32, #tpu.memory_space<vmem>>, vector<1x212xf32>
    %30 = vector.broadcast %29 : vector<1x212xf32> to vector<28x212xf32>
    %31 = arith.addf %28, %30 : vector<28x212xf32>
    %cst_31 = arith.constant 0.000000e+00 : f32
    %32 = vector.broadcast %cst_31 : f32 to vector<28x212xf32>
    %33 = arith.maximumf %31, %32 : vector<28x212xf32>
    %34 = vector.extract_strided_slice %33 {offsets = [0, 0], sizes = [28, 84], strides = [1, 1]} : vector<28x212xf32> to vector<28x84xf32>
    %35 = vector.extract_strided_slice %33 {offsets = [0, 128], sizes = [28, 84], strides = [1, 1]} : vector<28x212xf32> to vector<28x84xf32>
    %36 = arith.maximumf %34, %35 : vector<28x84xf32>
    %c0_32 = arith.constant 0 : index
    %c0_33 = arith.constant 0 : index
    %c0_34 = arith.constant 0 : index
    %37 = vector.load %arg4[%c0_32, %c0_33, %c0_34] : memref<2x14x28xf32, #tpu.memory_space<vmem>>, vector<1x14x28xf32>
    %38 = vector.shape_cast %37 : vector<1x14x28xf32> to vector<14x28xf32>
    %cst_35 = arith.constant dense<0.000000e+00> : vector<14x84xf32>
    %39 = tpu.matmul %38, %36, %cst_35 {dimension_numbers = #tpu.dot_dimension_numbers<[1], [0], [0], [1], [0, 0, 1, 1], [], []>} : vector<14x28xf32>, vector<28x84xf32>, vector<14x84xf32> -> vector<14x84xf32>
    %c1_36 = arith.constant 1 : index
    %c0_37 = arith.constant 0 : index
    %c0_38 = arith.constant 0 : index
    %40 = vector.load %arg4[%c1_36, %c0_37, %c0_38] : memref<2x14x28xf32, #tpu.memory_space<vmem>>, vector<1x14x28xf32>
    %41 = vector.shape_cast %40 : vector<1x14x28xf32> to vector<14x28xf32>
    %cst_39 = arith.constant dense<0.000000e+00> : vector<14x84xf32>
    %42 = tpu.matmul %41, %36, %cst_39 {dimension_numbers = #tpu.dot_dimension_numbers<[1], [0], [0], [1], [0, 0, 1, 1], [], []>} : vector<14x28xf32>, vector<28x84xf32>, vector<14x84xf32> -> vector<14x84xf32>
    %43 = arith.maximumf %39, %42 : vector<14x84xf32>
    %c0_40 = arith.constant 0 : index
    %c0_41 = arith.constant 0 : index
    %44 = vector.load %arg15[%c0_40, %c0_41] : memref<14x84xf32, #tpu.memory_space<vmem>>, vector<14x84xf32>
    tpu.vector_store %arg15[%c0_40, %c0_41], %43 {strides = array<i32>} : memref<14x84xf32, #tpu.memory_space<vmem>>, vector<14x84xf32>,
    %c0_42 = arith.constant 0 : index
    %c0_43 = arith.constant 0 : index
    %45 = vector.load %arg15[%c0_42, %c0_43] : memref<14x84xf32, #tpu.memory_space<vmem>>, vector<10x84xf32>
    %c0_44 = arith.constant 0 : index
    %c0_45 = arith.constant 0 : index
    %c0_46 = arith.constant 0 : index
    %46 = vector.load %arg5[%c0_44, %c0_45, %c0_46] : memref<5x84x208xf32, #tpu.memory_space<vmem>>, vector<1x84x208xf32>
    %47 = vector.shape_cast %46 : vector<1x84x208xf32> to vector<84x208xf32>
    %cst_47 = arith.constant dense<0.000000e+00> : vector<10x208xf32>
    %48 = tpu.matmul %45, %47, %cst_47 {dimension_numbers = #tpu.dot_dimension_numbers<[1], [0], [0], [1], [0, 0, 1, 1], [], []>} : vector<10x84xf32>, vector<84x208xf32>, vector<10x208xf32> -> vector<10x208xf32>
    %c1_48 = arith.constant 1 : index
    %c0_49 = arith.constant 0 : index
    %49 = vector.load %arg15[%c1_48, %c0_49] : memref<14x84xf32, #tpu.memory_space<vmem>>, vector<10x84xf32>
    %c1_50 = arith.constant 1 : index
    %c0_51 = arith.constant 0 : index
    %c0_52 = arith.constant 0 : index
    %50 = vector.load %arg5[%c1_50, %c0_51, %c0_52] : memref<5x84x208xf32, #tpu.memory_space<vmem>>, vector<1x84x208xf32>
    %51 = vector.shape_cast %50 : vector<1x84x208xf32> to vector<84x208xf32>
    %cst_53 = arith.constant dense<0.000000e+00> : vector<10x208xf32>
    %52 = tpu.matmul %49, %51, %cst_53 {dimension_numbers = #tpu.dot_dimension_numbers<[1], [0], [0], [1], [0, 0, 1, 1], [], []>} : vector<10x84xf32>, vector<84x208xf32>, vector<10x208xf32> -> vector<10x208xf32>
    %53 = arith.addf %48, %52 : vector<10x208xf32>
    %c2_54 = arith.constant 2 : index
    %c0_55 = arith.constant 0 : index
    %54 = vector.load %arg15[%c2_54, %c0_55] : memref<14x84xf32, #tpu.memory_space<vmem>>, vector<10x84xf32>
    %c2_56 = arith.constant 2 : index
    %c0_57 = arith.constant 0 : index
    %c0_58 = arith.constant 0 : index
    %55 = vector.load %arg5[%c2_56, %c0_57, %c0_58] : memref<5x84x208xf32, #tpu.memory_space<vmem>>, vector<1x84x208xf32>
    %56 = vector.shape_cast %55 : vector<1x84x208xf32> to vector<84x208xf32>
    %cst_59 = arith.constant dense<0.000000e+00> : vector<10x208xf32>
    %57 = tpu.matmul %54, %56, %cst_59 {dimension_numbers = #tpu.dot_dimension_numbers<[1], [0], [0], [1], [0, 0, 1, 1], [], []>} : vector<10x84xf32>, vector<84x208xf32>, vector<10x208xf32> -> vector<10x208xf32>
    %58 = arith.addf %53, %57 : vector<10x208xf32>
    %c3_60 = arith.constant 3 : index
    %c0_61 = arith.constant 0 : index
    %59 = vector.load %arg15[%c3_60, %c0_61] : memref<14x84xf32, #tpu.memory_space<vmem>>, vector<10x84xf32>
    %c3_62 = arith.constant 3 : index
    %c0_63 = arith.constant 0 : index
    %c0_64 = arith.constant 0 : index
    %60 = vector.load %arg5[%c3_62, %c0_63, %c0_64] : memref<5x84x208xf32, #tpu.memory_space<vmem>>, vector<1x84x208xf32>
    %61 = vector.shape_cast %60 : vector<1x84x208xf32> to vector<84x208xf32>
    %cst_65 = arith.constant dense<0.000000e+00> : vector<10x208xf32>
    %62 = tpu.matmul %59, %61, %cst_65 {dimension_numbers = #tpu.dot_dimension_numbers<[1], [0], [0], [1], [0, 0, 1, 1], [], []>} : vector<10x84xf32>, vector<84x208xf32>, vector<10x208xf32> -> vector<10x208xf32>
    %63 = arith.addf %58, %62 : vector<10x208xf32>
    %c4_66 = arith.constant 4 : index
    %c0_67 = arith.constant 0 : index
    %64 = vector.load %arg15[%c4_66, %c0_67] : memref<14x84xf32, #tpu.memory_space<vmem>>, vector<10x84xf32>
    %c4_68 = arith.constant 4 : index
    %c0_69 = arith.constant 0 : index
    %c0_70 = arith.constant 0 : index
    %65 = vector.load %arg5[%c4_68, %c0_69, %c0_70] : memref<5x84x208xf32, #tpu.memory_space<vmem>>, vector<1x84x208xf32>
    %66 = vector.shape_cast %65 : vector<1x84x208xf32> to vector<84x208xf32>
    %cst_71 = arith.constant dense<0.000000e+00> : vector<10x208xf32>
    %67 = tpu.matmul %64, %66, %cst_71 {dimension_numbers = #tpu.dot_dimension_numbers<[1], [0], [0], [1], [0, 0, 1, 1], [], []>} : vector<10x84xf32>, vector<84x208xf32>, vector<10x208xf32> -> vector<10x208xf32>
    %68 = arith.addf %63, %67 : vector<10x208xf32>
    %c0_72 = arith.constant 0 : index
    %c0_73 = arith.constant 0 : index
    %69 = vector.load %arg6[%c0_72, %c0_73] : memref<1x208xf32, #tpu.memory_space<vmem>>, vector<1x208xf32>
    %70 = vector.broadcast %69 : vector<1x208xf32> to vector<10x208xf32>
    %71 = arith.addf %68, %70 : vector<10x208xf32>
    %cst_74 = arith.constant 0.000000e+00 : f32
    %72 = vector.broadcast %cst_74 : f32 to vector<10x208xf32>
    %73 = arith.maximumf %71, %72 : vector<10x208xf32>
    %74 = vector.extract_strided_slice %73 {offsets = [0, 0], sizes = [10, 80], strides = [1, 1]} : vector<10x208xf32> to vector<10x80xf32>
    %75 = vector.extract_strided_slice %73 {offsets = [0, 128], sizes = [10, 80], strides = [1, 1]} : vector<10x208xf32> to vector<10x80xf32>
    %76 = arith.maximumf %74, %75 : vector<10x80xf32>
    %c0_75 = arith.constant 0 : index
    %c0_76 = arith.constant 0 : index
    %c0_77 = arith.constant 0 : index
    %77 = vector.load %arg7[%c0_75, %c0_76, %c0_77] : memref<2x5x10xf32, #tpu.memory_space<vmem>>, vector<1x5x10xf32>
    %78 = vector.shape_cast %77 : vector<1x5x10xf32> to vector<5x10xf32>
    %cst_78 = arith.constant dense<0.000000e+00> : vector<5x80xf32>
    %79 = tpu.matmul %78, %76, %cst_78 {dimension_numbers = #tpu.dot_dimension_numbers<[1], [0], [0], [1], [0, 0, 1, 1], [], []>} : vector<5x10xf32>, vector<10x80xf32>, vector<5x80xf32> -> vector<5x80xf32>
    %c1_79 = arith.constant 1 : index
    %c0_80 = arith.constant 0 : index
    %c0_81 = arith.constant 0 : index
    %80 = vector.load %arg7[%c1_79, %c0_80, %c0_81] : memref<2x5x10xf32, #tpu.memory_space<vmem>>, vector<1x5x10xf32>
    %81 = vector.shape_cast %80 : vector<1x5x10xf32> to vector<5x10xf32>
    %cst_82 = arith.constant dense<0.000000e+00> : vector<5x80xf32>
    %82 = tpu.matmul %81, %76, %cst_82 {dimension_numbers = #tpu.dot_dimension_numbers<[1], [0], [0], [1], [0, 0, 1, 1], [], []>} : vector<5x10xf32>, vector<10x80xf32>, vector<5x80xf32> -> vector<5x80xf32>
    %83 = arith.maximumf %79, %82 : vector<5x80xf32>
    %c0_83 = arith.constant 0 : index
    %c0_84 = arith.constant 0 : index
    %84 = vector.load %arg16[%c0_83, %c0_84] : memref<5x80xf32, #tpu.memory_space<vmem>>, vector<5x80xf32>
    tpu.vector_store %arg16[%c0_83, %c0_84], %83 {strides = array<i32>} : memref<5x80xf32, #tpu.memory_space<vmem>>, vector<5x80xf32>,
    %c0_85 = arith.constant 0 : index
    %c0_86 = arith.constant 0 : index
    %85 = vector.load %arg16[%c0_85, %c0_86] : memref<5x80xf32, #tpu.memory_space<vmem>>, vector<1x80xf32>
    %c0_87 = arith.constant 0 : index
    %c0_88 = arith.constant 0 : index
    %c0_89 = arith.constant 0 : index
    %86 = vector.load %arg8[%c0_87, %c0_88, %c0_89] : memref<5x80x120xf32, #tpu.memory_space<vmem>>, vector<1x80x120xf32>
    %87 = vector.shape_cast %86 : vector<1x80x120xf32> to vector<80x120xf32>
    %cst_90 = arith.constant dense<0.000000e+00> : vector<1x120xf32>
    %88 = tpu.matmul %85, %87, %cst_90 {dimension_numbers = #tpu.dot_dimension_numbers<[1], [0], [0], [1], [0, 0, 1, 1], [], []>} : vector<1x80xf32>, vector<80x120xf32>, vector<1x120xf32> -> vector<1x120xf32>
    %c1_91 = arith.constant 1 : index
    %c0_92 = arith.constant 0 : index
    %89 = vector.load %arg16[%c1_91, %c0_92] : memref<5x80xf32, #tpu.memory_space<vmem>>, vector<1x80xf32>
    %c1_93 = arith.constant 1 : index
    %c0_94 = arith.constant 0 : index
    %c0_95 = arith.constant 0 : index
    %90 = vector.load %arg8[%c1_93, %c0_94, %c0_95] : memref<5x80x120xf32, #tpu.memory_space<vmem>>, vector<1x80x120xf32>
    %91 = vector.shape_cast %90 : vector<1x80x120xf32> to vector<80x120xf32>
    %cst_96 = arith.constant dense<0.000000e+00> : vector<1x120xf32>
    %92 = tpu.matmul %89, %91, %cst_96 {dimension_numbers = #tpu.dot_dimension_numbers<[1], [0], [0], [1], [0, 0, 1, 1], [], []>} : vector<1x80xf32>, vector<80x120xf32>, vector<1x120xf32> -> vector<1x120xf32>
    %93 = arith.addf %88, %92 : vector<1x120xf32>
    %c2_97 = arith.constant 2 : index
    %c0_98 = arith.constant 0 : index
    %94 = vector.load %arg16[%c2_97, %c0_98] : memref<5x80xf32, #tpu.memory_space<vmem>>, vector<1x80xf32>
    %c2_99 = arith.constant 2 : index
    %c0_100 = arith.constant 0 : index
    %c0_101 = arith.constant 0 : index
    %95 = vector.load %arg8[%c2_99, %c0_100, %c0_101] : memref<5x80x120xf32, #tpu.memory_space<vmem>>, vector<1x80x120xf32>
    %96 = vector.shape_cast %95 : vector<1x80x120xf32> to vector<80x120xf32>
    %cst_102 = arith.constant dense<0.000000e+00> : vector<1x120xf32>
    %97 = tpu.matmul %94, %96, %cst_102 {dimension_numbers = #tpu.dot_dimension_numbers<[1], [0], [0], [1], [0, 0, 1, 1], [], []>} : vector<1x80xf32>, vector<80x120xf32>, vector<1x120xf32> -> vector<1x120xf32>
    %98 = arith.addf %93, %97 : vector<1x120xf32>
    %c3_103 = arith.constant 3 : index
    %c0_104 = arith.constant 0 : index
    %99 = vector.load %arg16[%c3_103, %c0_104] : memref<5x80xf32, #tpu.memory_space<vmem>>, vector<1x80xf32>
    %c3_105 = arith.constant 3 : index
    %c0_106 = arith.constant 0 : index
    %c0_107 = arith.constant 0 : index
    %100 = vector.load %arg8[%c3_105, %c0_106, %c0_107] : memref<5x80x120xf32, #tpu.memory_space<vmem>>, vector<1x80x120xf32>
    %101 = vector.shape_cast %100 : vector<1x80x120xf32> to vector<80x120xf32>
    %cst_108 = arith.constant dense<0.000000e+00> : vector<1x120xf32>
    %102 = tpu.matmul %99, %101, %cst_108 {dimension_numbers = #tpu.dot_dimension_numbers<[1], [0], [0], [1], [0, 0, 1, 1], [], []>} : vector<1x80xf32>, vector<80x120xf32>, vector<1x120xf32> -> vector<1x120xf32>
    %103 = arith.addf %98, %102 : vector<1x120xf32>
    %c4_109 = arith.constant 4 : index
    %c0_110 = arith.constant 0 : index
    %104 = vector.load %arg16[%c4_109, %c0_110] : memref<5x80xf32, #tpu.memory_space<vmem>>, vector<1x80xf32>
    %c4_111 = arith.constant 4 : index
    %c0_112 = arith.constant 0 : index
    %c0_113 = arith.constant 0 : index
    %105 = vector.load %arg8[%c4_111, %c0_112, %c0_113] : memref<5x80x120xf32, #tpu.memory_space<vmem>>, vector<1x80x120xf32>
    %106 = vector.shape_cast %105 : vector<1x80x120xf32> to vector<80x120xf32>
    %cst_114 = arith.constant dense<0.000000e+00> : vector<1x120xf32>
    %107 = tpu.matmul %104, %106, %cst_114 {dimension_numbers = #tpu.dot_dimension_numbers<[1], [0], [0], [1], [0, 0, 1, 1], [], []>} : vector<1x80xf32>, vector<80x120xf32>, vector<1x120xf32> -> vector<1x120xf32>
    %108 = arith.addf %103, %107 : vector<1x120xf32>
    %c0_115 = arith.constant 0 : index
    %c0_116 = arith.constant 0 : index
    %109 = vector.load %arg9[%c0_115, %c0_116] : memref<1x120xf32, #tpu.memory_space<vmem>>, vector<1x120xf32>
    %110 = arith.addf %108, %109 : vector<1x120xf32>
    %cst_117 = arith.constant 0.000000e+00 : f32
    %111 = vector.broadcast %cst_117 : f32 to vector<1x120xf32>
    %112 = arith.maximumf %110, %111 : vector<1x120xf32>
    %c0_118 = arith.constant 0 : index
    %c0_119 = arith.constant 0 : index
    %113 = vector.load %arg10[%c0_118, %c0_119] : memref<120x84xf32, #tpu.memory_space<vmem>>, vector<120x84xf32>
    %cst_120 = arith.constant dense<0.000000e+00> : vector<1x84xf32>
    %114 = tpu.matmul %112, %113, %cst_120 {dimension_numbers = #tpu.dot_dimension_numbers<[1], [0], [0], [1], [0, 0, 1, 1], [], []>} : vector<1x120xf32>, vector<120x84xf32>, vector<1x84xf32> -> vector<1x84xf32>
    %c0_121 = arith.constant 0 : index
    %c0_122 = arith.constant 0 : index
    %115 = vector.load %arg11[%c0_121, %c0_122] : memref<1x84xf32, #tpu.memory_space<vmem>>, vector<1x84xf32>
    %116 = arith.addf %114, %115 : vector<1x84xf32>
    %cst_123 = arith.constant 0.000000e+00 : f32
    %117 = vector.broadcast %cst_123 : f32 to vector<1x84xf32>
    %118 = arith.maximumf %116, %117 : vector<1x84xf32>
    %c0_124 = arith.constant 0 : index
    %c0_125 = arith.constant 0 : index
    %119 = vector.load %arg12[%c0_124, %c0_125] : memref<84x10xf32, #tpu.memory_space<vmem>>, vector<84x10xf32>
    %cst_126 = arith.constant dense<0.000000e+00> : vector<1x10xf32>
    %120 = tpu.matmul %118, %119, %cst_126 {dimension_numbers = #tpu.dot_dimension_numbers<[1], [0], [0], [1], [0, 0, 1, 1], [], []>} : vector<1x84xf32>, vector<84x10xf32>, vector<1x10xf32> -> vector<1x10xf32>
    %c0_127 = arith.constant 0 : index
    %c0_128 = arith.constant 0 : index
    %121 = vector.load %arg13[%c0_127, %c0_128] : memref<1x10xf32, #tpu.memory_space<vmem>>, vector<1x10xf32>
    %122 = arith.addf %120, %121 : vector<1x10xf32>
    %c0_129 = arith.constant 0 : index
    %c0_130 = arith.constant 0 : index
    %c0_131 = arith.constant 0 : index
    %123 = vector.load %arg14[%c0_129, %c0_130, %c0_131] : memref<1x1x10xf32, #tpu.memory_space<vmem>>, vector<1x1x10xf32>
    %124 = vector.shape_cast %123 : vector<1x1x10xf32> to vector<1x10xf32>
    %125 = vector.shape_cast %122 : vector<1x10xf32> to vector<1x1x10xf32>
    tpu.vector_store %arg14[%c0_129, %c0_130, %c0_131], %125 {strides = array<i32>} : memref<1x1x10xf32, #tpu.memory_space<vmem>>, vector<1x1x10xf32>,
    return
  }
  func.func @transform_0(%arg0: i32) -> (i32, i32, i32) {
    %c0_i32 = arith.constant 0 : i32
    %c0_i32_0 = arith.constant 0 : i32
    %c0_i32_1 = arith.constant 0 : i32
    return %arg0, %c0_i32, %c0_i32_0 : i32, i32, i32
  }
  func.func @transform_1(%arg0: i32) -> (i32, i32, i32) {
    %c0_i32 = arith.constant 0 : i32
    %c0_i32_0 = arith.constant 0 : i32
    %c0_i32_1 = arith.constant 0 : i32
    %c0_i32_2 = arith.constant 0 : i32
    return %c0_i32, %c0_i32_0, %c0_i32_1 : i32, i32, i32
  }
  func.func @transform_2(%arg0: i32) -> (i32, i32) {
    %c0_i32 = arith.constant 0 : i32
    %c0_i32_0 = arith.constant 0 : i32
    %c0_i32_1 = arith.constant 0 : i32
    return %c0_i32, %c0_i32_0 : i32, i32
  }
  func.func @transform_3(%arg0: i32) -> (i32, i32, i32) {
    %c0_i32 = arith.constant 0 : i32
    %c0_i32_0 = arith.constant 0 : i32
    %c0_i32_1 = arith.constant 0 : i32
    %c0_i32_2 = arith.constant 0 : i32
    return %c0_i32, %c0_i32_0, %c0_i32_1 : i32, i32, i32
  }
  func.func @transform_4(%arg0: i32) -> (i32, i32, i32) {
    %c0_i32 = arith.constant 0 : i32
    %c0_i32_0 = arith.constant 0 : i32
    %c0_i32_1 = arith.constant 0 : i32
    %c0_i32_2 = arith.constant 0 : i32
    return %c0_i32, %c0_i32_0, %c0_i32_1 : i32, i32, i32
  }
  func.func @transform_5(%arg0: i32) -> (i32, i32) {
    %c0_i32 = arith.constant 0 : i32
    %c0_i32_0 = arith.constant 0 : i32
    %c0_i32_1 = arith.constant 0 : i32
    return %c0_i32, %c0_i32_0 : i32, i32
  }
  func.func @transform_6(%arg0: i32) -> (i32, i32, i32) {
    %c0_i32 = arith.constant 0 : i32
    %c0_i32_0 = arith.constant 0 : i32
    %c0_i32_1 = arith.constant 0 : i32
    %c0_i32_2 = arith.constant 0 : i32
    return %c0_i32, %c0_i32_0, %c0_i32_1 : i32, i32, i32
  }
  func.func @transform_7(%arg0: i32) -> (i32, i32, i32) {
    %c0_i32 = arith.constant 0 : i32
    %c0_i32_0 = arith.constant 0 : i32
    %c0_i32_1 = arith.constant 0 : i32
    %c0_i32_2 = arith.constant 0 : i32
    return %c0_i32, %c0_i32_0, %c0_i32_1 : i32, i32, i32
  }
  func.func @transform_8(%arg0: i32) -> (i32, i32) {
    %c0_i32 = arith.constant 0 : i32
    %c0_i32_0 = arith.constant 0 : i32
    %c0_i32_1 = arith.constant 0 : i32
    return %c0_i32, %c0_i32_0 : i32, i32
  }
  func.func @transform_9(%arg0: i32) -> (i32, i32) {
    %c0_i32 = arith.constant 0 : i32
    %c0_i32_0 = arith.constant 0 : i32
    %c0_i32_1 = arith.constant 0 : i32
    return %c0_i32, %c0_i32_0 : i32, i32
  }
  func.func @transform_10(%arg0: i32) -> (i32, i32) {
    %c0_i32 = arith.constant 0 : i32
    %c0_i32_0 = arith.constant 0 : i32
    %c0_i32_1 = arith.constant 0 : i32
    return %c0_i32, %c0_i32_0 : i32, i32
  }
  func.func @transform_11(%arg0: i32) -> (i32, i32) {
    %c0_i32 = arith.constant 0 : i32
    %c0_i32_0 = arith.constant 0 : i32
    %c0_i32_1 = arith.constant 0 : i32
    return %c0_i32, %c0_i32_0 : i32, i32
  }
  func.func @transform_12(%arg0: i32) -> (i32, i32) {
    %c0_i32 = arith.constant 0 : i32
    %c0_i32_0 = arith.constant 0 : i32
    %c0_i32_1 = arith.constant 0 : i32
    return %c0_i32, %c0_i32_0 : i32, i32
  }
  func.func @transform_13(%arg0: i32) -> (i32, i32, i32) {
    %c0_i32 = arith.constant 0 : i32
    %c0_i32_0 = arith.constant 0 : i32
    %c0_i32_1 = arith.constant 0 : i32
    return %arg0, %c0_i32, %c0_i32_0 : i32, i32, i32
  }
}

</mosaic_0001>

<bundles_post_ra>
// kernel: net_forward.1
= control target key start
LH: loop header
LB: loop body
LE: loop exit
PB: predicated region body
PF: predicated region fallthrough
CT: control target
= control target key end

     0   :  { %18 = vsyncpa [#allocation5], 0  ;;  %s4455_s0 = inlined_call_operand.vmem [shape: f32[2,32,96], index: 0, kind: input, shape index: {}]   ;;  %s4456_s1 = inlined_call_operand.vmem [shape: f32[5,96,212], index: 1, kind: input, shape index: {}]   ;;  %s4457_s2 = inlined_call_operand.vmem [shape: f32[1,212], index: 2, kind: input, shape index: {}]   ;;  %s4458_s3 = inlined_call_operand.vmem [shape: f32[2,14,28], index: 3, kind: input, shape index: {}]   ;;  %s4459_s4 = inlined_call_operand.hbm [shape: f32[5,84,208], index: 4, kind: input, shape index: {}]   ;;  %s4460_s5 = inlined_call_operand.vmem [shape: f32[1,208], index: 5, kind: input, shape index: {}]   ;;  %s4461_s6 = inlined_call_operand.vmem [shape: f32[2,5,10], index: 6, kind: input, shape index: {}]   ;;  %s4462_s7 = inlined_call_operand.hbm [shape: f32[5,80,120], index: 7, kind: input, shape index: {}]   ;;  %s4463_s8 = inlined_call_operand.vmem [shape: f32[1,120], index: 8, kind: input, shape index: {}]   ;;  %s4464_s9 = inlined_call_operand.vmem [shape: f32[120,84], index: 9, kind: input, shape index: {}]   ;;  %s4465_s10 = inlined_call_operand.vmem [shape: f32[1,84], index: 10, kind: input, shape index: {}]   ;;  %s4466_s11 = inlined_call_operand.vmem [shape: f32[84,10], index: 11, kind: input, shape index: {}]   ;;  %s4467_s12 = inlined_call_operand.hbm [shape: f32[1,10], index: 12, kind: input, shape index: {}]   ;;  %s4468_s13 = inlined_call_operand.hbm [shape: f32[2,1,10], index: 13, kind: output, shape index: {}]  }
   0x1   :  { %19 = vsyncpa [#allocation8], 0 }
   0x2   :  { %20 = vsyncpa [#allocation6], 0 }
   0x3   :  { %22 = vsyncpa [#allocation6 + $0x1], 0  ;;  %s3622_s25 = smov 0   ;;  %s3624_s26 = smov 0  }
   0x4   :  { %s3626_s27 = smov 0   ;;  %s3628_s28 = smov 0  }
   0x5 LB: > { %4475 = sst [smem:[#allocation14_spill]] %s3528_s25  ;;  %s3643_s29 = sadd.s32 4294967295, %s3540_s28   ;;  %s3540_s28 = sphi %s3628_s28, %s4491_s28   ;;  %s3536_s27 = sphi %s3626_s27, %s4493_s27   ;;  %s3532_s26 = sphi %s3624_s26, %s4495_s26   ;;  %s3528_s25 = sphi %s3622_s25, %s4494_s25  }
   0x6   : > { %4476 = sst [smem:[#allocation15_spill]] %s3536_s27  ;;  %s2835_s30 = sadd.s32 4294967294, %s3540_s28  }
   0x7   : > { %s3647_s14 = sadd.s32 1, %s3540_s28   ;;  %s313_s15 = sadd.s32 1, %s3536_s27 }
   0x8   : > { %4477 = sst [smem:[#allocation16_spill]] %s3647_s14  ;;  %s310_s16 = ssub.s32 %s3540_s28, %s3647_s14 }
   0x9   : > { %p323_p0 = scmp.ne.s32.totalorder %s3536_s27, %s3532_s26  ;;  %p311_p1 = scmp.eq.s32.totalorder %s310_s16, 0 }
   0xa   : > { %p324_p2 = scmp.eq.s32.totalorder %s3643_s29, 1  ;;  %p329_p3 = scmp.ne.s32.totalorder %s3532_s26, %s3528_s25 }
   0xb   : > { %p330_p4 = scmp.eq.s32.totalorder %s2835_s30, 1  ;;  %p2836_p7 = scmp.ge.s32.totalorder %s3540_s28, 1 }
   0xc   : > { %s3658_s17 = scalar_select %p311_p1, %s3536_s27, %s313_s15  }
   0xd   : > { %p3660_p5 = por %p324_p2, %p323_p0  ;;  %p3664_p6 = por %p330_p4, %p329_p3 }
   0xe   : > { %4478 = sst [smem:[#allocation17_spill]] %s3658_s17  ;;  %p337_p8 = scmp.lt.s32.totalorder %s3540_s28, 3 }
   0xf   : > { %s4480_s19 = scalar_select %p3664_p6, 1, 0 }
  0x10   : > { %p4470_p9 = scmp.eq.s32.totalorder %s3643_s29, 0  ;;  %p3671_p10 = pnand %p2836_p7, %p337_p8 }
  0x11   : > { %4481 = sst [smem:[#allocation18_spill]] %s4480_s19  ;;  %s3542_s21 = smov [#allocation7]  }
  0x12   : > { %s377_s22 = sshll.u32 %s3542_s21, 4  ;;  %p3332_p11 = pneg %p3671_p10  ;;  %s378_s22 = int_to_ptr.vmem [resolvable:$true] %s377_s22 }
  0x13   : > { %s3543_s24 = smov [#allocation4]   ;;  %s3405_s15 = scalar_lea.vmem %s378_s22, 6400 }
  0x14   : > { %p3679_p12 = pnand %p4470_p9, %p3332_p11  ;;  %s358_s30 = sshll.u32 %s3543_s24, 4  ;;  %s359_s30 = int_to_ptr.vmem [resolvable:$true] %s358_s30 }
  0x15   : > { %p3406_p0 = scmp.ne.s32.totalorder %s378_s22, %s3405_s15  ;;  %p3413_p3 = scmp.lt.s32.totalorder %s378_s22, %s378_s22 }
  0x16   : > { %p3396_p13 = pneg %p3679_p12  ;;  %p3414_p4 = scmp.lt.s32.totalorder %s3405_s15, %s3405_s15 }
  0x18   : > { %p3408_p1 = pnand %p3406_p0, %p3396_p13  ;;  %p3415_p7 = por %p3414_p4, %p3413_p3 }
  0x1a   : > { %p3409_p2 = pneg %p3408_p1 }
  0x1c   : > { %p3416_p8 = pnand %p3415_p7, %p3409_p2 }
  0x1e   : > { %3419 = shalt.err (!%p3416_p8)
}
  0x1f   : > { %s3544_s16 = smov 128   ;;  %s3545_s21 = smov 8  }
  0x20   : > { %3338 = dma.hbm_to_vmem [thread:$0]  (!%p3679_p12), %s4462_s7, 6400, %s378_s22, [#allocation8], %s3544_s16, %s3544_s16, %s3545_s21  }
  0x21   : > { %s3431_s27 = scalar_lea.vmem %s359_s30, 14080  ;;  %p3439_p9 = scmp.lt.s32.totalorder %s359_s30, %s359_s30 }
  0x22   : > { %p3432_p11 = scmp.ne.s32.totalorder %s359_s30, %s3431_s27  ;;  %p3440_p6 = scmp.lt.s32.totalorder %s3431_s27, %s3431_s27 }
  0x24   : > { %p3434_p0 = pnand %p3432_p11, %p3396_p13  ;;  %p3441_p3 = por %p3440_p6, %p3439_p9 }
  0x26   : > { %p3435_p1 = pneg %p3434_p0 }
  0x28   : > { %p3442_p2 = pnand %p3441_p3, %p3435_p1 }
  0x2a   : > { %3445 = shalt.err (!%p3442_p2)
}
  0x2b   : > { %s3546_s15 = smov 256   ;;  %s3547_s14 = smov 16  }
  0x2c   : > { %3335 = dma.hbm_to_vmem [thread:$0]  (!%p3679_p12), %s4459_s4, 14080, %s359_s30, [#allocation5], %s3546_s15, %s3546_s15, %s3547_s14  }
  0x2d   : > { %s3548_s17 = smov [#allocation9]  }
  0x2e   : > { %s403_s22 = sshll.u32 %s3548_s17, 4  ;;  %s404_s22 = int_to_ptr.vmem [resolvable:$true] %s403_s22 }
  0x2f   : > { %s3457_s16 = scalar_lea.vmem %s404_s22, 16  ;;  %s3464_s27 = scalar_lea.vmem %s404_s22, 32 }
  0x30   : > { %p3458_p4 = scmp.ne.s32.totalorder %s404_s22, %s3457_s16  ;;  %p3465_p9 = scmp.lt.s32.totalorder %s404_s22, %s404_s22 }
  0x31   : > { %p3466_p8 = scmp.lt.s32.totalorder %s3464_s27, %s3457_s16 }
  0x32   : > { %p3460_p7 = pnand %p3458_p4, %p3396_p13 }
  0x33   : > { %p3467_p11 = por %p3466_p8, %p3465_p9 }
  0x34   : > { %p3461_p6 = pneg %p3460_p7 }
  0x36   : > { %p3468_p0 = pnand %p3467_p11, %p3461_p6 }
  0x38   : > { %3471 = shalt.err (!%p3468_p0)
}
  0x39   : > { %3341 = dma.hbm_to_vmem [thread:$0]  (!%p3679_p12), %s4467_s12, 16, %s404_s22, [#allocation8]  }
  0x3a   : > { %424 = sbr.rel (%p3671_p10) target bundleno = 1697 (0x6a1), region = 72  ;;  %p4484_p1 = scmp.eq.s32.totalorder (!%p3671_p10), %s3643_s29, 0 }
  0x3f   : > { %3515 = dma.done.wait (%p4484_p1), [#allocation5], 14080   ;;  %p4485_p13 = pmov %p4484_p1 }
  0x40   : > { %p4486_p3 = pmov %p4484_p1 }
  0x41   : > { %3517 = vsyncadd (%p4485_p13), [#allocation5], 4294953216 }
  0x42   : > { %3519 = dma.done.wait (%p4486_p3), [#allocation8], 6416   ;;  %p4487_p2 = pmov %p4484_p1 }
  0x43   : > { %v3549_v0 = vmov 0.0   ;;  %v2870_v1 = vld [vmem:[%s4456_s1 + $0x178] sm:$0xff]  ;;  %v2869_v3 = vld [vmem:[%s4456_s1 + $0x170] sm:$0xff]  ;;  %v2868_v5 = vld [vmem:[%s4456_s1 + $0x168] sm:$0xff]  ;;  %p475_p10 = scmp.lt.s32.totalorder %s3643_s29, 1  ;;  %vm537_vm0 = vcmask 785408  }
  0x44   : > { %3521 = vsyncadd (%p4487_p2), [#allocation8], 4294960880  ;;  %614 = vmatprep.mubr.f32.mxu0 %v3549_v0  ;;  %715 = vmatprep.mubr.f32.mxu1 %v3549_v0  ;;  %v507_v2 = vld [vmem:[%s4456_s1 + $0xb8] sm:$0xff]  ;;  %v506_v4 = vld [vmem:[%s4456_s1 + $0xb0] sm:$0xff]  ;;  %vm1188_vm1 = vcmask 228352   ;;  %vm1195_vm2 = vcmask 1043456  }
  0x45   : > { %558 = vmatprep.subr.mxu0 %v2870_v1  ;;  %659 = vmatprep.subr.mxu1 %v507_v2  ;;  %v505_v6 = vld [vmem:[%s4456_s1 + $0xa8] sm:$0xff]  ;;  %v2867_v7 = vld [vmem:[%s4456_s1 + $0x160] sm:$0xff]  ;;  %v2866_v9 = vld [vmem:[%s4456_s1 + $0x158] sm:$0xff]  ;;  %s3815_s22 = scalar_select %p475_p10, %s3643_s29, 1  ;;  %vm1362_vm3 = vcmask 685056   ;;  %vm1360_vm4 = vcmask 687104  }
  0x46   : > { %559 = vmatpush1.msra.mxu0 %v2869_v3  ;;  %660 = vmatpush1.msra.mxu1 %v506_v4  ;;  %v504_v8 = vld [vmem:[%s4456_s1 + $0xa0] sm:$0xff]  ;;  %v503_v10 = vld [vmem:[%s4456_s1 + $0x98] sm:$0xff]  ;;  %v2865_v11 = vld [vmem:[%s4456_s1 + $0x150] sm:$0xff]  ;;  %vm3550_vm5 = vmmov 0   ;;  %vm1972_vm6 = vcmask 1041408   ;;  %vm1968_vm7 = vcmask 80896  }
  0x47   : > { %560 = vmatprep.subr.mxu0 %v2868_v5  ;;  %661 = vmatprep.subr.mxu1 %v505_v6  ;;  %v502_v12 = vld [vmem:[%s4456_s1 + $0x90] sm:$0xff]  ;;  %v2864_v13 = vld [vmem:[%s4456_s1 + $0x148] sm:$0xff]  ;;  %v2863_v15 = vld [vmem:[%s4456_s1 + $0x140] sm:$0xff]  ;;  %s3007_s14 = sshll.u32 %s3815_s22, 5  ;;  %vm2122_vm8 = vcmask 651264   ;;  %vm2147_vm9 = vcmask 654336  }
  0x48   : > { %561 = vmatpush1.msra.mxu0 %v2867_v7  ;;  %662 = vmatpush1.msra.mxu1 %v504_v8  ;;  %v501_v14 = vld [vmem:[%s4456_s1 + $0x88] sm:$0xff]  ;;  %v500_v16 = vld [vmem:[%s4456_s1 + $0x80] sm:$0xff]  ;;  %v2862_v17 = vld [vmem:[%s4456_s1 + $0x138] sm:$0xff]  ;;  %s3863_s23 = scalar_lea.vmem %s4455_s0, %s3007_s14  ;;  %vm2571_vm10 = vcmask 982016   ;;  %s473_s15 = sand.u32 1, %s3532_s26   ;;  %vm2734_vm11 = vcmask 73728  }
  0x49   : > { %562 = vmatprep.subr.mxu0 %v2866_v9  ;;  %663 = vmatprep.subr.mxu1 %v503_v10  ;;  %v499_v18 = vld [vmem:[%s4456_s1 + $0x78] sm:$0xff]  ;;  %v2861_v19 = vld [vmem:[%s4456_s1 + $0x130] sm:$0xff]  ;;  %v2860_v21 = vld [vmem:[%s4456_s1 + $0x128] sm:$0xff]  ;;  %s3004_s17 = sshll.u32 %s3643_s29, 4  ;;  %s474_s16 = scalar_lea.vmem [#allocation10], %s473_s15 }
  0x4a   : > { %563 = vmatpush1.msra.mxu0 %v2865_v11  ;;  %664 = vmatpush1.msra.mxu1 %v502_v12  ;;  %v498_v20 = vld [vmem:[%s4456_s1 + $0x70] sm:$0xff]  ;;  %v497_v22 = vld [vmem:[%s4456_s1 + $0x68] sm:$0xff]  ;;  %v2859_v23 = vld [vmem:[%s4456_s1 + $0x120] sm:$0xff]  ;;  %s2749_s22 = sshll.u32 %s474_s16, 4  ;;  %s4420_s21 = scalar_lea.hbm %s4468_s13, %s3004_s17  ;;  %s2750_s22 = int_to_ptr.vmem [resolvable:$true] %s2749_s22 }
  0x4b   : > { %564 = vmatprep.subr.mxu0 %v2864_v13  ;;  %665 = vmatprep.subr.mxu1 %v501_v14  ;;  %v496_v24 = vld [vmem:[%s4456_s1 + $0x60] sm:$0xff]  ;;  %v2858_v25 = vld [vmem:[%s4456_s1 + $0x118] sm:$0xff]  ;;  %v2857_v27 = vld [vmem:[%s4456_s1 + $0x110] sm:$0xff]  ;;  %s2737_s25 = scalar_lea.sflag [#allocation6], %s473_s15  ;;  %s3551_s29 = smov [#allocation10]  }
  0x4c   : > { %565 = vmatpush1.msra.mxu0 %v2863_v15  ;;  %666 = vmatpush1.msra.mxu1 %v500_v16  ;;  %v495_v26 = vld [vmem:[%s4456_s1 + $0x58] sm:$0xff]  ;;  %v494_v28 = vld [vmem:[%s4456_s1 + $0x50] sm:$0xff]  ;;  %v2856_v29 = vld [vmem:[%s4456_s1 + $0x108] sm:$0xff]  ;;  %s3476_s19 = sshll.u32 %s3551_s29, 4  ;;  %s3477_s19 = int_to_ptr.vmem [resolvable:$false] %s3476_s19 }
  0x4d   : > { %566 = vmatprep.subr.mxu0 %v2862_v17  ;;  %667 = vmatprep.subr.mxu1 %v499_v18  ;;  %v493_v30 = vld [vmem:[%s4456_s1 + $0x48] sm:$0xff]  ;;  %v2855_v31 = vld [vmem:[%s4456_s1 + $0x100] sm:$0xff]  ;;  %v2854_v33 = vld [vmem:[%s4456_s1 + $0xf8] sm:$0xff]  ;;  %s3478_s20 = scalar_lea.vmem %s3477_s19, 32  ;;  %p3479_p6 = scmp.lt.s32.totalorder %s2750_s22, %s3477_s19 }
  0x4e   : > { %567 = vmatpush1.msra.mxu0 %v2861_v19  ;;  %668 = vmatpush1.msra.mxu1 %v498_v20  ;;  %v492_v32 = vld [vmem:[%s4456_s1 + $0x40] sm:$0xff]  ;;  %v491_v34 = vld [vmem:[%s4456_s1 + $0x38] sm:$0xff]  ;;  %v2853_v35 = vld [vmem:[%s4456_s1 + $0xf0] sm:$0xff] }
  0x4f   : > { %568 = vmatprep.subr.mxu0 %v2860_v21  ;;  %669 = vmatprep.subr.mxu1 %v497_v22  ;;  %v490_v36 = vld [vmem:[%s4456_s1 + $0x30] sm:$0xff]  ;;  %v2852_v37 = vld [vmem:[%s4456_s1 + $0xe8] sm:$0xff]  ;;  %v2851_v39 = vld [vmem:[%s4456_s1 + $0xe0] sm:$0xff] }
  0x50   : > { %569 = vmatpush1.msra.mxu0 %v2859_v23  ;;  %670 = vmatpush1.msra.mxu1 %v496_v24  ;;  %v489_v38 = vld [vmem:[%s4456_s1 + $0x28] sm:$0xff]  ;;  %v488_v40 = vld [vmem:[%s4456_s1 + $0x20] sm:$0xff]  ;;  %v2850_v41 = vld [vmem:[%s4456_s1 + $0xd8] sm:$0xff] }
  0x51   : > { %570 = vmatprep.subr.mxu0 %v2858_v25  ;;  %671 = vmatprep.subr.mxu1 %v495_v26  ;;  %v487_v42 = vld [vmem:[%s4456_s1 + $0x18] sm:$0xff]  ;;  %v2849_v43 = vld [vmem:[%s4456_s1 + $0xd0] sm:$0xff]  ;;  %v2848_v45 = vld [vmem:[%s4456_s1 + $0xc8] sm:$0xff] }
  0x52   : > { %571 = vmatpush1.msra.mxu0 %v2857_v27  ;;  %672 = vmatpush1.msra.mxu1 %v494_v28  ;;  %v486_v44 = vld [vmem:[%s4456_s1 + $0x10] sm:$0xff]  ;;  %v485_v46 = vld [vmem:[%s4456_s1 + $0x8] sm:$0xff]  ;;  %v2847_v47 = vld [vmem:[%s4456_s1 + $0xc0] sm:$0xff] }
  0x53   : > { %572 = vmatprep.subr.mxu0 %v2856_v29  ;;  %673 = vmatprep.subr.mxu1 %v493_v30  ;;  %v484_v48 = vld [vmem:[%s4456_s1] sm:$0xff]  ;;  %v2902_v51 = vld [vmem:[%s4456_s1 + $0x238] sm:$0xff]  ;;  %v2901_v53 = vld [vmem:[%s4456_s1 + $0x230] sm:$0xff] }
  0x54   : > { %573 = vmatpush1.msra.mxu0 %v2855_v31  ;;  %674 = vmatpush1.msra.mxu1 %v492_v32  ;;  %v508_v49 = vld [vmem:[%s3863_s23 + $0x1] sm:$0xff]  ;;  %v2930_v52 = vld [vmem:[%s4456_s1 + $0x2f8] sm:$0xff]  ;;  %v2929_v54 = vld [vmem:[%s4456_s1 + $0x2f0] sm:$0xff] }
  0x55   : > { %574 = vmatprep.subr.mxu0 %v2854_v33  ;;  %675 = vmatprep.subr.mxu1 %v491_v34  ;;  %v480_v50 = vld [vmem:[%s3863_s23] sm:$0xff]  ;;  %v2900_v55 = vld [vmem:[%s4456_s1 + $0x228] sm:$0xff]  ;;  %v2898_v59 = vld [vmem:[%s4456_s1 + $0x218] sm:$0xff] }
  0x56   : > { %575 = vmatpush1.msra.mxu0 %v2853_v35  ;;  %676 = vmatpush1.msra.mxu1 %v490_v36  ;;  %v2928_v56 = vld [vmem:[%s4456_s1 + $0x2e8] sm:$0xff]  ;;  %v2899_v57 = vld [vmem:[%s4456_s1 + $0x220] sm:$0xff]  ;;  %v2926_v60 = vld [vmem:[%s4456_s1 + $0x2d8] sm:$0xff] }
  0x57   : > { %576 = vmatprep.subr.mxu0 %v2852_v37  ;;  %677 = vmatprep.subr.mxu1 %v489_v38  ;;  %v2927_v58 = vld [vmem:[%s4456_s1 + $0x2e0] sm:$0xff]  ;;  %v2897_v61 = vld [vmem:[%s4456_s1 + $0x210] sm:$0xff]  ;;  %v2896_v63 = vld [vmem:[%s4456_s1 + $0x208] sm:$0xff] }
  0x58   : > { %577 = vmatpush1.msra.mxu0 %v2851_v39  ;;  %678 = vmatpush1.msra.mxu1 %v488_v40  ;;  %v2925_v62 = vld [vmem:[%s4456_s1 + $0x2d0] sm:$0xff]  ;;  %v2924_v1 = vld [vmem:[%s4456_s1 + $0x2c8] sm:$0xff]  ;;  %v2895_v2 = vld [vmem:[%s4456_s1 + $0x200] sm:$0xff] }
  0x59   : > { %578 = vmatprep.subr.mxu0 %v2850_v41  ;;  %679 = vmatprep.subr.mxu1 %v487_v42  ;;  %v2923_v3 = vld [vmem:[%s4456_s1 + $0x2c0] sm:$0xff]  ;;  %v2894_v4 = vld [vmem:[%s4456_s1 + $0x1f8] sm:$0xff]  ;;  %v2893_v5 = vld [vmem:[%s4456_s1 + $0x1f0] sm:$0xff] }
  0x5a   : > { %579 = vmatpush1.msra.mxu0 %v2849_v43  ;;  %680 = vmatpush1.msra.mxu1 %v486_v44  ;;  %v2892_v6 = vld [vmem:[%s4456_s1 + $0x1e8] sm:$0xff]  ;;  %v2922_v7 = vld [vmem:[%s4456_s1 + $0x2b8] sm:$0xff]  ;;  %v2891_v10 = vld [vmem:[%s4456_s1 + $0x1e0] sm:$0xff] }
  0x5b   : > { %580 = vmatprep.subr.mxu0 %v2848_v45  ;;  %681 = vmatprep.subr.mxu1 %v485_v46  ;;  %v509_v8 = vld [vmem:[%s3863_s23 + $0x9] sm:$0xff]  ;;  %v2890_v12 = vld [vmem:[%s4456_s1 + $0x1d8] sm:$0xff]  ;;  %v2919_v15 = vld [vmem:[%s4456_s1 + $0x2a0] sm:$0xff] }
  0x5c   : > { %581 = vmatpush1.msra.mxu0 %v2847_v47  ;;  %682 = vmatpush1.msra.mxu1 %v484_v48  ;;  %v481_v9 = vld [vmem:[%s3863_s23 + $0x8] sm:$0xff]  ;;  %v2921_v11 = vld [vmem:[%s4456_s1 + $0x2b0] sm:$0xff]  ;;  %v2918_v17 = vld [vmem:[%s4456_s1 + $0x298] sm:$0xff] }
  0x5d   : > { %2871 = vmatmul.mubr.msk.f32.vlgmr.msra.gmra.mxu0 %vm537_vm0, %v508_v49  ;;  %2875 = vmatmul.mubr.msk.f32.vlgmr.msra.gmra.mxu1 %vm537_vm0, %v480_v50  ;;  %v2920_v13 = vld [vmem:[%s4456_s1 + $0x2a8] sm:$0xff]  ;;  %v2889_v14 = vld [vmem:[%s4456_s1 + $0x1d0] sm:$0xff]  ;;  %v2887_v20 = vld [vmem:[%s4456_s1 + $0x1c0] sm:$0xff] }
  0x5e   : > { %789 = vmatprep.subr.mxu0 %v2902_v51  ;;  %927 = vmatprep.subr.mxu1 %v2930_v52  ;;  %v2888_v16 = vld [vmem:[%s4456_s1 + $0x1c8] sm:$0xff]  ;;  %v510_v18 = vld [vmem:[%s3863_s23 + $0x11] sm:$0xff]  ;;  %v2915_v25 = vld [vmem:[%s4456_s1 + $0x280] sm:$0xff] }
  0x5f   : > { %790 = vmatpush1.msra.mxu0 %v2901_v53  ;;  %928 = vmatpush1.msra.mxu1 %v2929_v54  ;;  %v482_v19 = vld [vmem:[%s3863_s23 + $0x10] sm:$0xff]  ;;  %v2886_v22 = vld [vmem:[%s4456_s1 + $0x1b8] sm:$0xff]  ;;  %v2916_v23 = vld [vmem:[%s4456_s1 + $0x288] sm:$0xff] }
  0x60   : > { %791 = vmatprep.subr.mxu0 %v2900_v55  ;;  %929 = vmatprep.subr.mxu1 %v2928_v56  ;;  %v2917_v21 = vld [vmem:[%s4456_s1 + $0x290] sm:$0xff]  ;;  %v2884_v26 = vld [vmem:[%s4456_s1 + $0x1a8] sm:$0xff]  ;;  %v2914_v27 = vld [vmem:[%s4456_s1 + $0x278] sm:$0xff] }
  0x61   : > { %792 = vmatpush1.msra.mxu0 %v2899_v57  ;;  %930 = vmatpush1.msra.mxu1 %v2927_v58  ;;  %v2885_v24 = vld [vmem:[%s4456_s1 + $0x1b0] sm:$0xff]  ;;  %v511_v28 = vld [vmem:[%s3863_s23 + $0x19] sm:$0xf]  ;;  %v2883_v30 = vld [vmem:[%s4456_s1 + $0x1a0] sm:$0xff] }
  0x62   : > { %793 = vmatprep.subr.mxu0 %v2898_v59  ;;  %931 = vmatprep.subr.mxu1 %v2926_v60  ;;  %v483_v29 = vld [vmem:[%s3863_s23 + $0x18] sm:$0xf]  ;;  %v2913_v31 = vld [vmem:[%s4456_s1 + $0x270] sm:$0xff]  ;;  %v2912_v33 = vld [vmem:[%s4456_s1 + $0x268] sm:$0xff] }
  0x63   : > { %794 = vmatpush1.msra.mxu0 %v2897_v61  ;;  %932 = vmatpush1.msra.mxu1 %v2925_v62  ;;  %v2882_v32 = vld [vmem:[%s4456_s1 + $0x198] sm:$0xff]  ;;  %v2881_v34 = vld [vmem:[%s4456_s1 + $0x190] sm:$0xff]  ;;  %v2911_v35 = vld [vmem:[%s4456_s1 + $0x260] sm:$0xff] }
  0x64   : > { %795 = vmatprep.subr.mxu0 %v2896_v63  ;;  %933 = vmatprep.subr.mxu1 %v2924_v1  ;;  %v2880_v36 = vld [vmem:[%s4456_s1 + $0x188] sm:$0xff]  ;;  %v2910_v37 = vld [vmem:[%s4456_s1 + $0x258] sm:$0xff]  ;;  %v2879_v38 = vld [vmem:[%s4456_s1 + $0x180] sm:$0xff] }
  0x65   : > { %796 = vmatpush1.msra.mxu0 %v2895_v2  ;;  %934 = vmatpush1.msra.mxu1 %v2923_v3  ;;  %v2909_v39 = vld [vmem:[%s4456_s1 + $0x250] sm:$0xff]  ;;  %v740_v40 = vld [vmem:[%s3863_s23 + $0x2] sm:$0xff]  ;;  %v2958_v42 = vld [vmem:[%s4456_s1 + $0x3b8] sm:$0xff] }
  0x66   : > { %797 = vmatprep.subr.mxu0 %v2894_v4  ;;  %620 = vmatprep.mubr.f32.mxu0 %v3549_v0  ;;  %v2908_v41 = vld [vmem:[%s4456_s1 + $0x248] sm:$0xff]  ;;  %v2907_v43 = vld [vmem:[%s4456_s1 + $0x240] sm:$0xff]  ;;  %v2957_v44 = vld [vmem:[%s4456_s1 + $0x3b0] sm:$0xff] }
  0x67   : > { %798 = vmatpush1.msra.mxu0 %v2893_v5  ;;  %721 = vmatprep.mubr.f32.mxu1 %v3549_v0  ;;  %v878_v45 = vld [vmem:[%s3863_s23 + $0x3] sm:$0xff]  ;;  %v2954_v49 = vld [vmem:[%s4456_s1 + $0x398] sm:$0xff]  ;;  %v2953_v50 = vld [vmem:[%s4456_s1 + $0x390] sm:$0xff] }
  0x68   : > { %799 = vmatprep.subr.mxu0 %v2892_v6  ;;  %935 = vmatprep.subr.mxu1 %v2922_v7  ;;  %v2956_v46 = vld [vmem:[%s4456_s1 + $0x3a8] sm:$0xff]  ;;  %v2955_v47 = vld [vmem:[%s4456_s1 + $0x3a0] sm:$0xff]  ;;  %v742_v54 = vld [vmem:[%s3863_s23 + $0x12] sm:$0xff] }
  0x69   : > { %2872 = vmatmul.mubr.msk.f32.gmra.mxu0 %vm537_vm0, %v509_v8  ;;  %2876 = vmatmul.mubr.msk.f32.gmra.mxu1 %vm537_vm0, %v481_v9  ;;  %v741_v48 = vld [vmem:[%s3863_s23 + $0xa] sm:$0xff]  ;;  %v2951_v53 = vld [vmem:[%s4456_s1 + $0x380] sm:$0xff]  ;;  %v2950_v55 = vld [vmem:[%s4456_s1 + $0x378] sm:$0xff] }
  0x6a   : > { %800 = vmatpush1.msra.mxu0 %v2891_v10  ;;  %936 = vmatpush1.msra.mxu1 %v2921_v11  ;;  %v879_v51 = vld [vmem:[%s3863_s23 + $0xb] sm:$0xff]  ;;  %v880_v57 = vld [vmem:[%s3863_s23 + $0x13] sm:$0xff]  ;;  %v2947_v59 = vld [vmem:[%s4456_s1 + $0x360] sm:$0xff] }
  0x6b   : > { %801 = vmatprep.subr.mxu0 %v2890_v12  ;;  %937 = vmatprep.subr.mxu1 %v2920_v13  ;;  %v2952_v52 = vld [vmem:[%s4456_s1 + $0x388] sm:$0xff]  ;;  %v2949_v56 = vld [vmem:[%s4456_s1 + $0x370] sm:$0xff]  ;;  %v743_v60 = vld [vmem:[%s3863_s23 + $0x1a] sm:$0xf] }
  0x6c   : > { %802 = vmatpush1.msra.mxu0 %v2889_v14  ;;  %938 = vmatpush1.msra.mxu1 %v2919_v15  ;;  %v2948_v58 = vld [vmem:[%s4456_s1 + $0x368] sm:$0xff]  ;;  %v2946_v61 = vld [vmem:[%s4456_s1 + $0x358] sm:$0xff]  ;;  %v2945_v62 = vld [vmem:[%s4456_s1 + $0x350] sm:$0xff] }
  0x6d   : > { %626 = vmatprep.mubr.f32.mxu0 %v3549_v0  ;;  %727 = vmatprep.mubr.f32.mxu1 %v3549_v0  ;;  %v881_v63 = vld [vmem:[%s3863_s23 + $0x1b] sm:$0xf]  ;;  %v2944_v1 = vld [vmem:[%s4456_s1 + $0x348] sm:$0xff]  ;;  %v2943_v2 = vld [vmem:[%s4456_s1 + $0x340] sm:$0xff] }
  0x6e   : > { %803 = vmatprep.subr.mxu0 %v2888_v16  ;;  %939 = vmatprep.subr.mxu1 %v2918_v17  ;;  %v2942_v3 = vld [vmem:[%s4456_s1 + $0x338] sm:$0xff]  ;;  %v2941_v4 = vld [vmem:[%s4456_s1 + $0x330] sm:$0xff]  ;;  %v2940_v5 = vld [vmem:[%s4456_s1 + $0x328] sm:$0xff] }
  0x6f   : > { %2873 = vmatmul.mubr.msk.f32.gmra.mxu0 %vm537_vm0, %v510_v18  ;;  %2877 = vmatmul.mubr.msk.f32.gmra.mxu1 %vm537_vm0, %v482_v19  ;;  %v2939_v6 = vld [vmem:[%s4456_s1 + $0x320] sm:$0xff]  ;;  %v2938_v7 = vld [vmem:[%s4456_s1 + $0x318] sm:$0xff]  ;;  %v2937_v8 = vld [vmem:[%s4456_s1 + $0x310] sm:$0xff] }
  0x70   : > { %804 = vmatpush1.msra.mxu0 %v2887_v20  ;;  %940 = vmatpush1.msra.mxu1 %v2917_v21  ;;  %v2936_v9 = vld [vmem:[%s4456_s1 + $0x308] sm:$0xff]  ;;  %v2935_v10 = vld [vmem:[%s4456_s1 + $0x300] sm:$0xff]  ;;  %v1018_v13 = vld [vmem:[%s3863_s23 + $0x14] sm:$0xff] }
  0x71   : > { %805 = vmatprep.subr.mxu0 %v2886_v22  ;;  %941 = vmatprep.subr.mxu1 %v2916_v23  ;;  %v1016_v11 = vld [vmem:[%s3863_s23 + $0x4] sm:$0xff]  ;;  %v1017_v12 = vld [vmem:[%s3863_s23 + $0xc] sm:$0xff]  ;;  %v1019_v14 = vld [vmem:[%s3863_s23 + $0x1c] sm:$0xf]  ;;  %s3472_s23 = scalar_lea.vmem %s2750_s22, 16 }
  0x72   : > { %806 = vmatpush1.msra.mxu0 %v2885_v24  ;;  %942 = vmatpush1.msra.mxu1 %v2915_v25  ;;  %v1186_v15 = vld [vmem:[%s4458_s3] sm:$0xff]  ;;  %v1412_v16 = vld [vmem:[#allocation4 + $0x158] sm:$0xf]  ;;  %v1411_v17 = vld [vmem:[#allocation4 + $0x150] sm:$0xf]  ;;  %p3473_p12 = scmp.ne.s32.totalorder %s2750_s22, %s3472_s23  ;;  %p3480_p9 = scmp.lt.s32.totalorder %s3478_s20, %s3472_s23 }
  0x73   : > { %632 = vmatprep.mubr.f32.mxu0 %v3549_v0  ;;  %733 = vmatprep.mubr.f32.mxu1 %v3549_v0  ;;  %v1410_v18 = vld [vmem:[#allocation4 + $0x148] sm:$0xff]  ;;  %v1409_v19 = vld [vmem:[#allocation4 + $0x140] sm:$0xff] }
  0x74   : > { %807 = vmatprep.subr.mxu0 %v2884_v26  ;;  %943 = vmatprep.subr.mxu1 %v2914_v27  ;;  %p3474_p4 = pnand %p3473_p12, %p3660_p5  ;;  %p3481_p8 = por %p3480_p9, %p3479_p6 }
  0x75   : > { %2874 = vmatmul.mubr.msk.f32.gmra.mxu0 %vm537_vm0, %v511_v28  ;;  %2878 = vmatmul.mubr.msk.f32.gmra.mxu1 %vm537_vm0, %v483_v29 }
  0x76   : > { %808 = vmatpush1.msra.mxu0 %v2883_v30  ;;  %944 = vmatpush1.msra.mxu1 %v2913_v31  ;;  %p3475_p7 = pneg %p3474_p4 }
  0x77   : > { %809 = vmatprep.subr.mxu0 %v2882_v32  ;;  %945 = vmatprep.subr.mxu1 %v2912_v33 }
  0x78   : > { %810 = vmatpush1.msra.mxu0 %v2881_v34  ;;  %946 = vmatpush1.msra.mxu1 %v2911_v35  ;;  %p3482_p11 = pnand %p3481_p8, %p3475_p7 }
  0x79   : > { %811 = vmatprep.subr.mxu0 %v2880_v36  ;;  %947 = vmatprep.subr.mxu1 %v2910_v37 }
  0x7a   : > { %812 = vmatpush1.msra.mxu0 %v2879_v38  ;;  %845 = vmatprep.mubr.f32.mxu0 %v3549_v0 }
  0x7b   : > { %948 = vmatpush1.msra.mxu1 %v2909_v39  ;;  %2903 = vmatmul.mubr.msk.f32.vlgmr.msra.gmra.mxu0 %vm537_vm0, %v740_v40 }
  0x7c   : > { %949 = vmatprep.subr.mxu1 %v2908_v41  ;;  %1065 = vmatprep.subr.mxu0 %v2958_v42 }
  0x7d   : > { %950 = vmatpush1.msra.mxu1 %v2907_v43  ;;  %983 = vmatprep.mubr.f32.mxu1 %v3549_v0 }
  0x7e   : > { %1066 = vmatpush1.msra.mxu0 %v2957_v44  ;;  %2931 = vmatmul.mubr.msk.f32.vlgmr.msra.gmra.mxu1 %vm537_vm0, %v878_v45 }
  0x7f   : > { %1067 = vmatprep.subr.mxu0 %v2956_v46  ;;  %851 = vmatprep.mubr.f32.mxu0 %v3549_v0 }
  0x80   : > { %1068 = vmatpush1.msra.mxu0 %v2955_v47  ;;  %989 = vmatprep.mubr.f32.mxu1 %v3549_v0 }
  0x81   : > { %2904 = vmatmul.mubr.msk.f32.gmra.mxu0 %vm537_vm0, %v741_v48  ;;  %1069 = vmatprep.subr.mxu0 %v2954_v49  ;;  %v1156_v49 = vlaneseq }
  0x82   : > { %1070 = vmatpush1.msra.mxu0 %v2953_v50  ;;  %2932 = vmatmul.mubr.msk.f32.gmra.mxu1 %vm537_vm0, %v879_v51 }
  0x83   : > { %1071 = vmatprep.subr.mxu0 %v2952_v52  ;;  %857 = vmatprep.mubr.f32.mxu0 %v3549_v0  ;;  %v4158_v52 = vshrl.u32 %v1156_v49, 7 }
  0x84   : > { %1072 = vmatpush1.msra.mxu0 %v2951_v53  ;;  %995 = vmatprep.mubr.f32.mxu1 %v3549_v0 }
  0x85   : > { %2905 = vmatmul.mubr.msk.f32.gmra.mxu0 %vm537_vm0, %v742_v54  ;;  %1073 = vmatprep.subr.mxu0 %v2950_v55 }
  0x86   : > { %1074 = vmatpush1.msra.mxu0 %v2949_v56  ;;  %2933 = vmatmul.mubr.msk.f32.gmra.mxu1 %vm537_vm0, %v880_v57 }
  0x87   : > { %1075 = vmatprep.subr.mxu0 %v2948_v58  ;;  %863 = vmatprep.mubr.f32.mxu0 %v3549_v0 }
  0x88   : > { %1076 = vmatpush1.msra.mxu0 %v2947_v59  ;;  %1001 = vmatprep.mubr.f32.mxu1 %v3549_v0 }
  0x89   : > { %2906 = vmatmul.mubr.msk.f32.gmra.mxu0 %vm537_vm0, %v743_v60  ;;  %1077 = vmatprep.subr.mxu0 %v2946_v61 }
  0x8a   : > { %1078 = vmatpush1.msra.mxu0 %v2945_v62  ;;  %2934 = vmatmul.mubr.msk.f32.gmra.mxu1 %vm537_vm0, %v881_v63  ;;  %v1158_v63 = vsub.s32 0, %v4158_v52 }
  0x8b   : > { %1079 = vmatprep.subr.mxu0 %v2944_v1  ;;  %1121 = vmatprep.mubr.f32.mxu0 %v3549_v0 }
  0x8c   : > { %1080 = vmatpush1.msra.mxu0 %v2943_v2  ;;  %3117 = vmatprep.mubr.msk.f32.mxu1 %vm1188_vm1, %v1186_v15 }
  0x8d   : > { %1081 = vmatprep.subr.mxu0 %v2942_v3 }
  0x8e   : > { %1082 = vmatpush1.msra.mxu0 %v2941_v4 }
  0x8f   : > { %1083 = vmatprep.subr.mxu0 %v2940_v5 }
  0x90   : > { %1084 = vmatpush1.msra.mxu0 %v2939_v6 }
  0x91   : > { %1085 = vmatprep.subr.mxu0 %v2938_v7 }
  0x92   : > { %1086 = vmatpush1.msra.mxu0 %v2937_v8 }
  0x93   : > { %1087 = vmatprep.subr.mxu0 %v2936_v9  ;;  %v1162_v9 = vsub.s32 1, %v4158_v52  ;;  %v1967_v52 = vld [vmem:[%s4461_s6] sm:$0x1f] }
  0x94   : > { %1088 = vmatpush1.msra.mxu0 %v2935_v10 }
  0x95   : > { %2959 = vmatmul.mubr.msk.f32.vlgmr.msra.gmra.mxu0 %vm537_vm0, %v1016_v11  ;;  %2971 = vmatprep.subr.msk.mxu0 %vm1195_vm2, %v1412_v16 }
  0x96   : > { %1127 = vmatprep.mubr.f32.mxu0 %v3549_v0  ;;  %2972 = vmatpush1.msk.msra.mxu0 %vm1195_vm2, %v1411_v17 }
  0x97   : > { %1437 = vmatprep.subr.mxu0 %v1410_v18 }
  0x98   : > { %1438 = vmatpush1.msra.mxu0 %v1409_v19 }
  0x99   : > { %2960 = vmatmul.mubr.msk.f32.gmra.mxu0 %vm537_vm0, %v1017_v12 }
  0x9a   : > { %1133 = vmatprep.mubr.f32.mxu0 %v3549_v0 }
  0x9d   : > { %2961 = vmatmul.mubr.msk.f32.gmra.mxu0 %vm537_vm0, %v1018_v13  ;;  %v1154_v13 = vld [vmem:[%s4457_s2] sm:$0x3] }
  0x9e   : > { %1139 = vmatprep.mubr.f32.mxu0 %v3549_v0 }
  0xa1   : > { %2962 = vmatmul.mubr.msk.f32.gmra.mxu0 %vm537_vm0, %v1019_v14 }
  0xa2   : > { %1489 = vmatprep.mubr.f32.mxu0 %v3549_v0 }
 0x11d   : > { %v616_v20 = vpop.f32.mrf.mxu0  ;;  %v717_v21 = vpop.f32.mrf.mxu1 }
 0x11e   : > { %v718_v6 = vadd.f32 %v717_v21, %v616_v20  ;;  %v1159_v21 = vrot.slane %v1154_v13, %v1158_v63 }
 0x11f   : > { %v618_v22 = vpop.f32.mrf.mxu0  ;;  %v719_v24 = vpop.f32.mrf.mxu1 }
 0x120   : > { %v720_v60 = vadd.f32 %v719_v24, %v618_v22  ;;  %v1163_v24 = vrot.slane %v1154_v13, %v1162_v9  ;;  %v1403_v13 = vld [vmem:[#allocation4 + $0x110] sm:$0xff] }
 0x129   : > { %v622_v23 = vpop.f32.mrf.mxu0  ;;  %v723_v26 = vpop.f32.mrf.mxu1 }
 0x12a   : > { %v724_v61 = vadd.f32 %v723_v26, %v622_v23 }
 0x12b   : > { %v624_v25 = vpop.f32.mrf.mxu0  ;;  %v725_v28 = vpop.f32.mrf.mxu1 }
 0x12c   : > { %v726_v56 = vadd.f32 %v725_v28, %v624_v25 }
 0x12f   : > { %v628_v27 = vpop.f32.mrf.mxu0  ;;  %v729_v30 = vpop.f32.mrf.mxu1 }
 0x130   : > { %v730_v57 = vadd.f32 %v729_v30, %v628_v27 }
 0x131   : > { %v630_v29 = vpop.f32.mrf.mxu0  ;;  %v731_v33 = vpop.f32.mrf.mxu1 }
 0x132   : > { %v732_v54 = vadd.f32 %v731_v33, %v630_v29 }
 0x135   : > { %v634_v31 = vpop.f32.mrf.mxu0  ;;  %v735_v35 = vpop.f32.mrf.mxu1 }
 0x136   : > { %v736_v58 = vadd.f32 %v735_v35, %v634_v31 }
 0x137   : > { %v636_v32 = vpop.f32.mrf.mxu0  ;;  %v737_v37 = vpop.f32.mrf.mxu1 }
 0x138   : > { %v738_v2 = vadd.f32 %v737_v37, %v636_v32 }
 0x13b   : > { %v847_v34 = vpop.f32.mrf.mxu0 }
 0x13c   : > { %v870_v14 = vadd.f32 %v847_v34, %v718_v6  ;;  %v1406_v6 = vld [vmem:[#allocation4 + $0x128] sm:$0xff] }
 0x13d   : > { %v849_v36 = vpop.f32.mrf.mxu0 }
 0x13e   : > { %v985_v39 = vpop.f32.mrf.mxu1  ;;  %v871_v7 = vadd.f32 %v849_v36, %v720_v60  ;;  %v1387_v60 = vld [vmem:[#allocation4 + $0xa8] sm:$0xf] }
 0x13f   : > { %v1008_v30 = vadd.f32 %v985_v39, %v870_v14  ;;  %v1378_v14 = vld [vmem:[#allocation4 + $0x60] sm:$0xff] }
 0x140   : > { %v987_v41 = vpop.f32.mrf.mxu1 }
 0x141   : > { %v853_v38 = vpop.f32.mrf.mxu0  ;;  %v1009_v23 = vadd.f32 %v987_v41, %v871_v7  ;;  %v1381_v7 = vld [vmem:[#allocation4 + $0x78] sm:$0xff] }
 0x142   : > { %v991_v43 = vpop.f32.mrf.mxu1  ;;  %v872_v8 = vadd.f32 %v853_v38, %v724_v61  ;;  %v1386_v61 = vld [vmem:[#allocation4 + $0xa0] sm:$0xf] }
 0x143   : > { %v855_v40 = vpop.f32.mrf.mxu0 }
 0x144   : > { %v993_v45 = vpop.f32.mrf.mxu1  ;;  %v873_v3 = vadd.f32 %v855_v40, %v726_v56  ;;  %v1010_v20 = vadd.f32 %v991_v43, %v872_v8  ;;  %v1405_v8 = vld [vmem:[#allocation4 + $0x120] sm:$0xff] }
 0x145   : > { %v859_v42 = vpop.f32.mrf.mxu0 }
 0x146   : > { %v997_v47 = vpop.f32.mrf.mxu1  ;;  %v874_v4 = vadd.f32 %v859_v42, %v730_v57  ;;  %v1011_v17 = vadd.f32 %v993_v45, %v873_v3  ;;  %v1187_v57 = vld [vmem:[%s4458_s3 + $0x8] sm:$0x3f]  ;;  %v1383_v3 = vld [vmem:[#allocation4 + $0x88] sm:$0xff] }
 0x147   : > { %v861_v44 = vpop.f32.mrf.mxu0 }
 0x148   : > { %v999_v51 = vpop.f32.mrf.mxu1  ;;  %v875_v59 = vadd.f32 %v861_v44, %v732_v54  ;;  %v1012_v18 = vadd.f32 %v997_v47, %v874_v4  ;;  %v1407_v4 = vld [vmem:[#allocation4 + $0x130] sm:$0xff] }
 0x149   : > { %v865_v46 = vpop.f32.mrf.mxu0 }
 0x14a   : > { %v1003_v62 = vpop.f32.mrf.mxu1  ;;  %v876_v5 = vadd.f32 %v865_v46, %v736_v58  ;;  %v1013_v11 = vadd.f32 %v999_v51, %v875_v59  ;;  %v2966_v58 = vld [vmem:[%s4458_s3 + $0x10] sm:$0xff]  ;;  %v2967_v59 = vld [vmem:[%s4458_s3 + $0x18] sm:$0x3f] }
 0x14b   : > { %v867_v48 = vpop.f32.mrf.mxu0 }
 0x14c   : > { %v877_v12 = vadd.f32 %v867_v48, %v738_v2  ;;  %v1005_v15 = vpop.f32.mrf.mxu1  ;;  %v1014_v19 = vadd.f32 %v1003_v62, %v876_v5  ;;  %v1385_v62 = vld [vmem:[#allocation4 + $0x98] sm:$0xff]  ;;  %v1382_v5 = vld [vmem:[#allocation4 + $0x80] sm:$0xff] }
 0x14d   : > { %v1408_v2 = vld [vmem:[#allocation4 + $0x138] sm:$0xff] }
 0x14e   : > { %v1015_v26 = vadd.f32 %v1005_v15, %v877_v12  ;;  %1439 = vmatprep.subr.mxu0 %v1408_v2  ;;  %v1379_v12 = vld [vmem:[#allocation4 + $0x68] sm:$0xff]  ;;  %v1608_v2 = vld [vmem:[#allocation4 + $0x1d0] sm:$0xff] }
 0x14f   : > { %1440 = vmatpush1.msra.mxu0 %v1407_v4  ;;  %v1402_v15 = vld [vmem:[#allocation4 + $0x108] sm:$0xff] }
 0x150   : > { %1441 = vmatprep.subr.mxu0 %v1406_v6  ;;  %v1607_v4 = vld [vmem:[#allocation4 + $0x1c8] sm:$0xff]  ;;  %v1606_v6 = vld [vmem:[#allocation4 + $0x1c0] sm:$0xff] }
 0x151   : > { %1442 = vmatpush1.msra.mxu0 %v1405_v8  ;;  %v1605_v8 = vld [vmem:[#allocation4 + $0x1b8] sm:$0xff] }
 0x155   : > { %v1123_v50 = vpop.f32.mrf.mxu0 }
 0x156   : > { %v1146_v37 = vadd.f32 %v1123_v50, %v1008_v30  ;;  %v1370_v30 = vld [vmem:[#allocation4 + $0x20] sm:$0xff] }
 0x157   : > { %v1125_v53 = vpop.f32.mrf.mxu0 }
 0x158   : > { %v1147_v31 = vadd.f32 %v1125_v53, %v1009_v23  ;;  %v1166_v47 = vadd.f32 %v1159_v21, %v1146_v37  ;;  %v1399_v23 = vld [vmem:[#allocation4 + $0xf0] sm:$0xff] }
 0x159   : > { %v1129_v55 = vpop.f32.mrf.mxu0  ;;  %v1391_v37 = vld [vmem:[#allocation4 + $0xb0] sm:$0xff] }
 0x15a   : > { %v1148_v33 = vadd.f32 %v1129_v55, %v1010_v20  ;;  %v1167_v42 = vadd.f32 %v1163_v24, %v1147_v31  ;;  %v1174_v50 = vmax.f32 %v1166_v47, 0.0  ;;  %v1374_v20 = vld [vmem:[#allocation4 + $0x40] sm:$0xff]  ;;  %v1394_v31 = vld [vmem:[#allocation4 + $0xc8] sm:$0xff] }
 0x15b   : > { %v1131_v1 = vpop.f32.mrf.mxu0 }
 0x15c   : > { %v1149_v27 = vadd.f32 %v1131_v1, %v1011_v17  ;;  %v1168_v43 = vadd.f32 %v1159_v21, %v1148_v33  ;;  %v1175_v39 = vmax.f32 %v1167_v42, 0.0  ;;  %v1384_v1 = vld [vmem:[#allocation4 + $0x90] sm:$0xff]  ;;  %v1401_v17 = vld [vmem:[#allocation4 + $0x100] sm:$0xff] }
 0x15d   : > { %v1135_v10 = vpop.f32.mrf.mxu0  ;;  %v1393_v33 = vld [vmem:[#allocation4 + $0xc0] sm:$0xff] }
 0x15e   : > { %v1150_v28 = vadd.f32 %v1135_v10, %v1012_v18  ;;  %v1169_v38 = vadd.f32 %v1163_v24, %v1149_v27  ;;  %v1176_v53 = vmax.f32 %v1168_v43, 0.0  ;;  %v1182_v56 = vmax.f32 %v1174_v50, %v1175_v39  ;;  %v1380_v10 = vld [vmem:[#allocation4 + $0x70] sm:$0xff]  ;;  %v1396_v27 = vld [vmem:[#allocation4 + $0xd8] sm:$0xff] }
 0x15f   : > { %v1137_v16 = vpop.f32.mrf.mxu0  ;;  %v1376_v18 = vld [vmem:[#allocation4 + $0x50] sm:$0xff] }
 0x160   : > { %v1151_v22 = vadd.f32 %v1137_v16, %v1013_v11  ;;  %v1170_v40 = vadd.f32 %v1159_v21, %v1150_v28  ;;  %v1177_v48 = vmax.f32 %v1169_v38, 0.0  ;;  %v1404_v11 = vld [vmem:[#allocation4 + $0x118] sm:$0xff]  ;;  %v1371_v28 = vld [vmem:[#allocation4 + $0x28] sm:$0xff]  ;;  %v1366_v38 = vld [vmem:[#allocation4] sm:$0xff] }
 0x161   : > { %v1141_v25 = vpop.f32.mrf.mxu0  ;;  %1443 = vmatprep.subr.mxu0 %v1404_v11  ;;  %v1377_v16 = vld [vmem:[#allocation4 + $0x58] sm:$0xff]  ;;  %v1612_v50 = vld [vmem:[#allocation4 + $0x1f0] sm:$0xff] }
 0x162   : > { %v1152_v29 = vadd.f32 %v1141_v25, %v1014_v19  ;;  %v1171_v34 = vadd.f32 %v1163_v24, %v1151_v22  ;;  %v1178_v49 = vmax.f32 %v1170_v40, 0.0  ;;  %v1183_v55 = vmax.f32 %v1176_v53, %v1177_v48  ;;  %1444 = vmatpush1.msra.mxu0 %v1403_v13  ;;  %v1400_v19 = vld [vmem:[#allocation4 + $0xf8] sm:$0xff]  ;;  %v1375_v22 = vld [vmem:[#allocation4 + $0x48] sm:$0xff]  ;;  %v1397_v25 = vld [vmem:[#allocation4 + $0xe0] sm:$0xff] }
 0x163   : > { %v1143_v32 = vpop.f32.mrf.mxu0  ;;  %1445 = vmatprep.subr.mxu0 %v1402_v15  ;;  %v1615_v40 = vld [vmem:[#allocation4 + $0x208] sm:$0xf]  ;;  %v1614_v48 = vld [vmem:[#allocation4 + $0x200] sm:$0xf]  ;;  %v1604_v11 = vld [vmem:[#allocation4 + $0x1b0] sm:$0xff] }
 0x164   : > { %v1172_v35 = vadd.f32 %v1159_v21, %v1152_v29  ;;  %v1153_v36 = vadd.f32 %v1143_v32, %v1015_v26  ;;  %v1179_v44 = vmax.f32 %v1171_v34, 0.0  ;;  %1446 = vmatpush1.msra.mxu0 %v1401_v17  ;;  %v1398_v21 = vld [vmem:[#allocation4 + $0xe8] sm:$0xff]  ;;  %v1372_v26 = vld [vmem:[#allocation4 + $0x30] sm:$0xff]  ;;  %v1369_v32 = vld [vmem:[#allocation4 + $0x18] sm:$0xff] }
 0x165   : > { %1447 = vmatprep.subr.mxu0 %v1400_v19  ;;  %v1395_v29 = vld [vmem:[#allocation4 + $0xd0] sm:$0xff]  ;;  %v1603_v13 = vld [vmem:[#allocation4 + $0x1a8] sm:$0xff]  ;;  %v1602_v15 = vld [vmem:[#allocation4 + $0x1a0] sm:$0xff] }
 0x166   : > { %v1173_v41 = vadd.f32 %v1163_v24, %v1153_v36  ;;  %v1180_v45 = vmax.f32 %v1172_v35, 0.0  ;;  %v1184_v54 = vmax.f32 %v1178_v49, %v1179_v44  ;;  %1448 = vmatpush1.msra.mxu0 %v1399_v23  ;;  %v1373_v24 = vld [vmem:[#allocation4 + $0x38] sm:$0xff]  ;;  %v1368_v34 = vld [vmem:[#allocation4 + $0x10] sm:$0xff]  ;;  %v1367_v36 = vld [vmem:[#allocation4 + $0x8] sm:$0xff] }
 0x167   : > { %1449 = vmatprep.subr.mxu0 %v1398_v21  ;;  %v1392_v35 = vld [vmem:[#allocation4 + $0xb8] sm:$0xff]  ;;  %v1732_v49 = vld [vmem:[#allocation4 + $0x2b0] sm:$0xf]  ;;  %v1599_v23 = vld [vmem:[#allocation4 + $0x188] sm:$0xff] }
 0x168   : > { %v1181_v46 = vmax.f32 %v1173_v41, 0.0  ;;  %1450 = vmatpush1.msra.mxu0 %v1397_v25  ;;  %v1733_v41 = vld [vmem:[#allocation4 + $0x2b8] sm:$0xf]  ;;  %v1600_v19 = vld [vmem:[#allocation4 + $0x190] sm:$0xff]  ;;  %v1598_v21 = vld [vmem:[#allocation4 + $0x180] sm:$0xff] }
 0x169   : > { %1451 = vmatprep.subr.mxu0 %v1396_v27  ;;  %v1601_v17 = vld [vmem:[#allocation4 + $0x198] sm:$0xff]  ;;  %v1596_v27 = vld [vmem:[#allocation4 + $0x170] sm:$0xff] }
 0x16a   : > { %v1185_v51 = vmax.f32 %v1180_v45, %v1181_v46  ;;  %1452 = vmatpush1.msra.mxu0 %v1395_v29  ;;  %v1597_v25 = vld [vmem:[#allocation4 + $0x178] sm:$0xff]  ;;  %v1595_v29 = vld [vmem:[#allocation4 + $0x168] sm:$0xff] }
 0x16b   : > { %1453 = vmatprep.subr.mxu0 %v1394_v31  ;;  %v1594_v31 = vld [vmem:[#allocation4 + $0x160] sm:$0xff] }
 0x16c   : > { %3109 = vmatprep.subr.msk.mxu1 %vm1195_vm2, %v1185_v51  ;;  %1454 = vmatpush1.msra.mxu0 %v1393_v33  ;;  %v1851_v33 = vld [vmem:[#allocation4 + $0x368] sm:$0xf] }
 0x16d   : > { %3110 = vmatpush3.msk.msra.mxu1 %vm1195_vm2, %v1185_v51  ;;  %1455 = vmatprep.subr.mxu0 %v1392_v35 }
 0x16e   : > { %3111 = vmatprep.subr.mxu1 %v1184_v54  ;;  %1456 = vmatpush1.msra.mxu0 %v1391_v37  ;;  %v1849_v37 = vld [vmem:[#allocation4 + $0x358] sm:$0xff] }
 0x16f   : > { %3112 = vmatpush3.msra.mxu1 %v1184_v54  ;;  %2979 = vmatprep.subr.msk.mxu0 %vm1195_vm2, %v1615_v40  ;;  %v1847_v40 = vld [vmem:[#allocation4 + $0x348] sm:$0xff] }
 0x170   : > { %3113 = vmatprep.subr.mxu1 %v1183_v55 }
 0x171   : > { %3114 = vmatpush3.msra.mxu1 %v1183_v55 }
 0x172   : > { %3115 = vmatprep.subr.mxu1 %v1182_v56 }
 0x173   : > { %3116 = vmatpush3.msra.mxu1 %v1182_v56 }
 0x174   : > { %3120 = vmatprep.subr.msk.mxu1 %vm1195_vm2, %v1185_v51  ;;  %3118 = vmatmul.mubr.msk.f32.vlgmr.msra.gmra.mxu1 %vm1188_vm1, %v1187_v57  ;;  %v1729_v57 = vld [vmem:[#allocation4 + $0x298] sm:$0xff] }
 0x175   : > { %3121 = vmatpush3.msk.msra.mxu1 %vm1195_vm2, %v1185_v51  ;;  %3128 = vmatprep.mubr.msk.f32.mxu1 %vm1188_vm1, %v2966_v58  ;;  %v1613_v51 = vld [vmem:[#allocation4 + $0x1f8] sm:$0xff]  ;;  %v1610_v58 = vld [vmem:[#allocation4 + $0x1e0] sm:$0xff] }
 0x176   : > { %3122 = vmatprep.subr.mxu1 %v1184_v54 }
 0x177   : > { %3123 = vmatpush3.msra.mxu1 %v1184_v54  ;;  %v1731_v54 = vld [vmem:[#allocation4 + $0x2a8] sm:$0xff] }
 0x178   : > { %3124 = vmatprep.subr.mxu1 %v1183_v55 }
 0x179   : > { %3125 = vmatpush3.msra.mxu1 %v1183_v55  ;;  %v1730_v55 = vld [vmem:[#allocation4 + $0x2a0] sm:$0xff] }
 0x17a   : > { %3126 = vmatprep.subr.mxu1 %v1182_v56 }
 0x17b   : > { %3127 = vmatpush3.msra.mxu1 %v1182_v56  ;;  %v1611_v56 = vld [vmem:[#allocation4 + $0x1e8] sm:$0xff] }
 0x17c   : > { %3129 = vmatmul.mubr.msk.f32.vlgmr.msra.gmra.mxu1 %vm1188_vm1, %v2967_v59  ;;  %2975 = vmatprep.subr.msk.mxu1 %vm1195_vm2, %v1387_v60  ;;  %v1728_v59 = vld [vmem:[#allocation4 + $0x290] sm:$0xff]  ;;  %v1609_v60 = vld [vmem:[#allocation4 + $0x1d8] sm:$0xff] }
 0x17d   : > { %2976 = vmatpush1.msk.msra.mxu1 %vm1195_vm2, %v1386_v61  ;;  %1578 = vmatprep.mubr.f32.mxu1 %v3549_v0 }
 0x17e   : > { %1526 = vmatprep.subr.mxu1 %v1385_v62 }
 0x17f   : > { %1527 = vmatpush1.msra.mxu1 %v1384_v1  ;;  %v1727_v1 = vld [vmem:[#allocation4 + $0x288] sm:$0xff] }
 0x180   : > { %1528 = vmatprep.subr.mxu1 %v1383_v3  ;;  %v1726_v3 = vld [vmem:[#allocation4 + $0x280] sm:$0xff] }
 0x181   : > { %1529 = vmatpush1.msra.mxu1 %v1382_v5  ;;  %v1725_v5 = vld [vmem:[#allocation4 + $0x278] sm:$0xff] }
 0x182   : > { %1530 = vmatprep.subr.mxu1 %v1381_v7  ;;  %v1724_v7 = vld [vmem:[#allocation4 + $0x270] sm:$0xff] }
 0x183   : > { %1531 = vmatpush1.msra.mxu1 %v1380_v10  ;;  %v1723_v10 = vld [vmem:[#allocation4 + $0x268] sm:$0xff] }
 0x184   : > { %1532 = vmatprep.subr.mxu1 %v1379_v12  ;;  %v1722_v12 = vld [vmem:[#allocation4 + $0x260] sm:$0xff] }
 0x185   : > { %1533 = vmatpush1.msra.mxu1 %v1378_v14  ;;  %v1721_v14 = vld [vmem:[#allocation4 + $0x258] sm:$0xff] }
 0x186   : > { %1534 = vmatprep.subr.mxu1 %v1377_v16  ;;  %v1720_v16 = vld [vmem:[#allocation4 + $0x250] sm:$0xff] }
 0x187   : > { %1535 = vmatpush1.msra.mxu1 %v1376_v18  ;;  %v1719_v18 = vld [vmem:[#allocation4 + $0x248] sm:$0xff] }
 0x188   : > { %1536 = vmatprep.subr.mxu1 %v1375_v22  ;;  %v1718_v22 = vld [vmem:[#allocation4 + $0x240] sm:$0xff] }
 0x189   : > { %1537 = vmatpush1.msra.mxu1 %v1374_v20  ;;  %v1717_v20 = vld [vmem:[#allocation4 + $0x238] sm:$0xff] }
 0x18a   : > { %1538 = vmatprep.subr.mxu1 %v1373_v24  ;;  %v1716_v24 = vld [vmem:[#allocation4 + $0x230] sm:$0xff] }
 0x18b   : > { %1539 = vmatpush1.msra.mxu1 %v1372_v26  ;;  %v1715_v26 = vld [vmem:[#allocation4 + $0x228] sm:$0xff] }
 0x18c   : > { %1540 = vmatprep.subr.mxu1 %v1371_v28  ;;  %v1714_v28 = vld [vmem:[#allocation4 + $0x220] sm:$0xff] }
 0x18d   : > { %1541 = vmatpush1.msra.mxu1 %v1370_v30  ;;  %v1713_v30 = vld [vmem:[#allocation4 + $0x218] sm:$0xff] }
 0x18e   : > { %1542 = vmatprep.subr.mxu1 %v1369_v32  ;;  %v1712_v32 = vld [vmem:[#allocation4 + $0x210] sm:$0xff] }
 0x18f   : > { %1543 = vmatpush1.msra.mxu1 %v1368_v34 }
 0x190   : > { %1544 = vmatprep.subr.mxu1 %v1367_v36  ;;  %v1850_v36 = vld [vmem:[#allocation4 + $0x360] sm:$0xf] }
 0x191   : > { %1545 = vmatpush1.msra.mxu1 %v1366_v38  ;;  %v1848_v38 = vld [vmem:[#allocation4 + $0x350] sm:$0xff] }
 0x192   : > { %2983 = vmatprep.subr.msk.mxu1 %vm1195_vm2, %v1733_v41 }
 0x234   : > { %v3119_v42 = vpop.f32.mrf.mxu1 }
 0x236   : > { %v1265_v43 = vpop.f32.mrf.mxu1 }
 0x23c   : > { %v3130_v44 = vpop.f32.mrf.mxu1 }
 0x23d   : > { %v1359_v45 = vmax.f32 %v3119_v42, %v3130_v44  ;;  %v1846_v42 = vld [vmem:[#allocation4 + $0x340] sm:$0xff]  ;;  %v1845_v44 = vld [vmem:[#allocation4 + $0x338] sm:$0xff] }
 0x23e   : > { %v1349_v46 = vpop.f32.mrf.mxu1 }
 0x23f   : > { %1363 = vst.msk [vmem:[#allocation2 + $0x8] sm:$0x3f] %vm1362_vm3, %v1359_v45  ;;  %v1358_v47 = vmax.f32 %v1265_v43, %v1349_v46  ;;  %v1844_v45 = vld [vmem:[#allocation4 + $0x330] sm:$0xff]  ;;  %v1843_v46 = vld [vmem:[#allocation4 + $0x328] sm:$0xff] }
 0x241   : > { %1361 = vst.msk [vmem:[#allocation2] sm:$0xff] %vm1360_vm4, %v1358_v47  ;;  %v1842_v47 = vld [vmem:[#allocation4 + $0x320] sm:$0xff] }
 0x246   : > { %v1389_v61 = vld [vmem:[#allocation2 + $0x9] sm:$0x3]  ;;  %v1710_v41 = vld [vmem:[#allocation2 + $0xb] sm:$0x3] }
 0x247   : > { %v1365_v62 = vld [vmem:[#allocation2 + $0x8] sm:$0x3]  ;;  %v1592_v43 = vld [vmem:[#allocation2 + $0xa] sm:$0x3] }
 0x248   : > { %v1388_v39 = vld [vmem:[#allocation2 + $0x1] sm:$0xff] }
 0x249   : > { %v1364_v53 = vld [vmem:[#allocation2] sm:$0xff]  ;;  %2973 = vmatmul.mubr.msk.f32.vlgmr.msra.gmra.mxu0 %vm1360_vm4, %v1388_v39  ;;  %v1838_v39 = vld [vmem:[#allocation4 + $0x300] sm:$0xff] }
 0x24a   : > { %2977 = vmatmul.mubr.msk.f32.vlgmr.msra.gmra.mxu1 %vm1360_vm4, %v1364_v53  ;;  %2980 = vmatpush1.msk.msra.mxu0 %vm1195_vm2, %v1614_v48  ;;  %v1591_v34 = vld [vmem:[#allocation2 + $0x2] sm:$0xff]  ;;  %v1841_v48 = vld [vmem:[#allocation4 + $0x318] sm:$0xff] }
 0x24b   : > { %2984 = vmatpush1.msk.msra.mxu1 %vm1195_vm2, %v1732_v49  ;;  %1640 = vmatprep.subr.mxu0 %v1613_v51  ;;  %v1709_v35 = vld [vmem:[#allocation2 + $0x3] sm:$0xff]  ;;  %v1837_v53 = vld [vmem:[#allocation4 + $0x2f8] sm:$0xff] }
 0x24c   : > { %1758 = vmatprep.subr.mxu1 %v1731_v54  ;;  %1641 = vmatpush1.msra.mxu0 %v1612_v50  ;;  %v1840_v49 = vld [vmem:[#allocation4 + $0x310] sm:$0xff]  ;;  %v1839_v51 = vld [vmem:[#allocation4 + $0x308] sm:$0xff] }
 0x24d   : > { %1759 = vmatpush1.msra.mxu1 %v1730_v55  ;;  %1495 = vmatprep.mubr.f32.mxu0 %v3549_v0  ;;  %v1836_v54 = vld [vmem:[#allocation4 + $0x2f0] sm:$0xff]  ;;  %v1835_v50 = vld [vmem:[#allocation4 + $0x2e8] sm:$0xff]  ;;  %v1834_v55 = vld [vmem:[#allocation4 + $0x2e0] sm:$0xff] }
 0x24e   : > { %1584 = vmatprep.mubr.f32.mxu1 %v3549_v0  ;;  %1642 = vmatprep.subr.mxu0 %v1611_v56  ;;  %v1833_v56 = vld [vmem:[#allocation4 + $0x2d8] sm:$0xff] }
 0x24f   : > { %1760 = vmatprep.subr.mxu1 %v1729_v57  ;;  %2974 = vmatmul.mubr.msk.f32.gmra.mxu0 %vm1360_vm4, %v1389_v61  ;;  %v1832_v57 = vld [vmem:[#allocation4 + $0x2d0] sm:$0xff] }
 0x250   : > { %2978 = vmatmul.mubr.msk.f32.gmra.mxu1 %vm1360_vm4, %v1365_v62  ;;  %1643 = vmatpush1.msra.mxu0 %v1610_v58  ;;  %v1831_v58 = vld [vmem:[#allocation4 + $0x2c8] sm:$0xff]  ;;  %v1828_v61 = vld [vmem:[#allocation2 + $0xc] sm:$0x3]  ;;  %v2134_v62 = vld [vmem:[#allocation7 + $0x48] sm:$0xff] }
 0x251   : > { %1761 = vmatpush1.msra.mxu1 %v1728_v59  ;;  %1644 = vmatprep.subr.mxu0 %v1609_v60  ;;  %v1830_v59 = vld [vmem:[#allocation4 + $0x2c0] sm:$0xff]  ;;  %v1827_v60 = vld [vmem:[#allocation2 + $0x4] sm:$0xff] }
 0x252   : > { %1762 = vmatprep.subr.mxu1 %v1727_v1  ;;  %1645 = vmatpush1.msra.mxu0 %v1608_v2  ;;  %v2133_v1 = vld [vmem:[#allocation7 + $0x40] sm:$0xff]  ;;  %v2132_v2 = vld [vmem:[#allocation7 + $0x38] sm:$0xff] }
 0x253   : > { %1763 = vmatpush1.msra.mxu1 %v1726_v3  ;;  %1646 = vmatprep.subr.mxu0 %v1607_v4 }
 0x254   : > { %1764 = vmatprep.subr.mxu1 %v1725_v5  ;;  %1647 = vmatpush1.msra.mxu0 %v1606_v6 }
 0x255   : > { %1765 = vmatpush1.msra.mxu1 %v1724_v7  ;;  %1648 = vmatprep.subr.mxu0 %v1605_v8 }
 0x256   : > { %1766 = vmatprep.subr.mxu1 %v1723_v10  ;;  %1649 = vmatpush1.msra.mxu0 %v1604_v11 }
 0x257   : > { %1767 = vmatpush1.msra.mxu1 %v1722_v12  ;;  %1650 = vmatprep.subr.mxu0 %v1603_v13 }
 0x258   : > { %1768 = vmatprep.subr.mxu1 %v1721_v14  ;;  %1651 = vmatpush1.msra.mxu0 %v1602_v15 }
 0x259   : > { %1769 = vmatpush1.msra.mxu1 %v1720_v16  ;;  %1652 = vmatprep.subr.mxu0 %v1601_v17 }
 0x25a   : > { %1770 = vmatprep.subr.mxu1 %v1719_v18  ;;  %1653 = vmatpush1.msra.mxu0 %v1600_v19 }
 0x25b   : > { %1771 = vmatpush1.msra.mxu1 %v1718_v22  ;;  %1654 = vmatprep.subr.mxu0 %v1599_v23 }
 0x25c   : > { %1772 = vmatprep.subr.mxu1 %v1717_v20  ;;  %1655 = vmatpush1.msra.mxu0 %v1598_v21 }
 0x25d   : > { %1773 = vmatpush1.msra.mxu1 %v1716_v24  ;;  %1656 = vmatprep.subr.mxu0 %v1597_v25 }
 0x25e   : > { %1774 = vmatprep.subr.mxu1 %v1715_v26  ;;  %1657 = vmatpush1.msra.mxu0 %v1596_v27 }
 0x25f   : > { %1775 = vmatpush1.msra.mxu1 %v1714_v28  ;;  %1658 = vmatprep.subr.mxu0 %v1595_v29  ;;  %v1945_v29 = vld [vmem:[%s4460_s5] sm:$0x3] }
 0x260   : > { %1776 = vmatprep.subr.mxu1 %v1713_v30  ;;  %1659 = vmatpush1.msra.mxu0 %v1594_v31 }
 0x261   : > { %1692 = vmatprep.mubr.f32.mxu0 %v3549_v0  ;;  %1777 = vmatpush1.msra.mxu1 %v1712_v32 }
 0x262   : > { %1810 = vmatprep.mubr.f32.mxu1 %v3549_v0  ;;  %2981 = vmatmul.mubr.msk.f32.vlgmr.msra.gmra.mxu0 %vm1360_vm4, %v1591_v34  ;;  %v1954_v34 = vrot.slane %v1945_v29, %v1162_v9 }
 0x263   : > { %2985 = vmatmul.mubr.msk.f32.vlgmr.msra.gmra.mxu1 %vm1360_vm4, %v1709_v35  ;;  %2987 = vmatprep.subr.msk.mxu0 %vm1195_vm2, %v1851_v33 }
 0x264   : > { %1698 = vmatprep.mubr.f32.mxu0 %v3549_v0  ;;  %2988 = vmatpush1.msk.msra.mxu0 %vm1195_vm2, %v1850_v36 }
 0x265   : > { %1816 = vmatprep.mubr.f32.mxu1 %v3549_v0  ;;  %1876 = vmatprep.subr.mxu0 %v1849_v37 }
 0x266   : > { %3131 = vmatprep.subr.mxu1 %v3549_v0  ;;  %1877 = vmatpush1.msra.mxu0 %v1848_v38 }
 0x267   : > { %2986 = vmatmul.mubr.msk.f32.gmra.mxu1 %vm1360_vm4, %v1710_v41  ;;  %2982 = vmatmul.mubr.msk.f32.gmra.mxu0 %vm1360_vm4, %v1592_v43 }
 0x268   : > { %1878 = vmatprep.subr.mxu0 %v1847_v40  ;;  %1928 = vmatprep.mubr.f32.mxu0 %v3549_v0  ;;  %v1950_v40 = vrot.slane %v1945_v29, %v1158_v63  ;;  %v2993_v63 = vld [vmem:[%s4461_s6 + $0x8] sm:$0x1f]  ;;  %v2385_v29 = vld [vmem:[#allocation7 + $0x108] sm:$0xff] }
 0x269   : > { %1879 = vmatpush1.msra.mxu0 %v1846_v42  ;;  %3135 = vmatprep.mubr.msk.f32.mxu1 %vm3550_vm5, %v3549_v0 }
 0x26a   : > { %1880 = vmatprep.subr.mxu0 %v1845_v44 }
 0x26b   : > { %1881 = vmatpush1.msra.mxu0 %v1844_v45 }
 0x26c   : > { %1882 = vmatprep.subr.mxu0 %v1843_v46 }
 0x26d   : > { %1883 = vmatpush1.msra.mxu0 %v1842_v47 }
 0x26e   : > { %1884 = vmatprep.subr.mxu0 %v1841_v48 }
 0x26f   : > { %1885 = vmatpush1.msra.mxu0 %v1840_v49 }
 0x270   : > { %1886 = vmatprep.subr.mxu0 %v1839_v51 }
 0x271   : > { %1887 = vmatpush1.msra.mxu0 %v1838_v39 }
 0x272   : > { %1888 = vmatprep.subr.mxu0 %v1837_v53 }
 0x273   : > { %1889 = vmatpush1.msra.mxu0 %v1836_v54  ;;  %v2146_v54 = vld [vmem:[#allocation7 + $0x98] sm:$0xff] }
 0x274   : > { %1890 = vmatprep.subr.mxu0 %v1835_v50  ;;  %v2145_v50 = vld [vmem:[#allocation7 + $0x90] sm:$0xff] }
 0x275   : > { %1891 = vmatpush1.msra.mxu0 %v1834_v55  ;;  %v2144_v55 = vld [vmem:[#allocation7 + $0x88] sm:$0xff] }
 0x276   : > { %1892 = vmatprep.subr.mxu0 %v1833_v56  ;;  %v2143_v56 = vld [vmem:[#allocation7 + $0x80] sm:$0xff] }
 0x277   : > { %1893 = vmatpush1.msra.mxu0 %v1832_v57  ;;  %v2131_v57 = vld [vmem:[#allocation7 + $0x30] sm:$0xff] }
 0x278   : > { %1894 = vmatprep.subr.mxu0 %v1831_v58  ;;  %v2142_v58 = vld [vmem:[#allocation7 + $0x78] sm:$0xff] }
 0x279   : > { %1895 = vmatpush1.msra.mxu0 %v1830_v59  ;;  %v2130_v59 = vld [vmem:[#allocation7 + $0x28] sm:$0xff] }
 0x27a   : > { %2989 = vmatmul.mubr.msk.f32.vlgmr.msra.gmra.mxu0 %vm1360_vm4, %v1827_v60  ;;  %3168 = vmatprep.subr.mxu0 %v3549_v0  ;;  %v2141_v60 = vld [vmem:[#allocation7 + $0x70] sm:$0xff] }
 0x27b   : > { %1934 = vmatprep.mubr.f32.mxu0 %v3549_v0  ;;  %3169 = vmatpush3.msra.mxu0 %v2134_v62  ;;  %v2140_v62 = vld [vmem:[#allocation7 + $0x68] sm:$0xff] }
 0x27c   : > { %3170 = vmatprep.subr.mxu0 %v3549_v0 }
 0x27d   : > { %3171 = vmatpush3.msra.mxu0 %v2133_v1  ;;  %v2128_v1 = vld [vmem:[#allocation7 + $0x18] sm:$0xff] }
 0x27e   : > { %2990 = vmatmul.mubr.msk.f32.gmra.mxu0 %vm1360_vm4, %v1828_v61  ;;  %3172 = vmatprep.subr.mxu0 %v3549_v0  ;;  %v2129_v61 = vld [vmem:[#allocation7 + $0x20] sm:$0xff] }
 0x27f   : > { %3188 = vmatprep.mubr.msk.f32.mxu0 %vm3550_vm5, %v3549_v0  ;;  %3173 = vmatpush3.msra.mxu0 %v2132_v2  ;;  %v2139_v2 = vld [vmem:[#allocation7 + $0x60] sm:$0xff] }
 0x280   : > { %3174 = vmatprep.subr.mxu0 %v3549_v0 }
 0x281   : > { %3175 = vmatpush3.msra.mxu0 %v2131_v57  ;;  %v2559_v57 = vld [vmem:[%s4464_s9 + $0x20] sm:$0xff] }
 0x282   : > { %3176 = vmatprep.subr.mxu0 %v3549_v0 }
 0x283   : > { %3177 = vmatpush3.msra.mxu0 %v2130_v59  ;;  %v2557_v59 = vld [vmem:[%s4464_s9 + $0x10] sm:$0xff] }
 0x284   : > { %3178 = vmatprep.subr.mxu0 %v3549_v0 }
 0x285   : > { %3179 = vmatpush3.msra.mxu0 %v2129_v61  ;;  %v2555_v61 = vld [vmem:[%s4464_s9] sm:$0xff] }
 0x286   : > { %3180 = vmatprep.subr.mxu0 %v3549_v0 }
 0x287   : > { %3181 = vmatpush3.msra.mxu0 %v2128_v1  ;;  %v2655_v1 = vld [vmem:[%s4466_s11 + $0x48] sm:$0xff] }
 0x288   : > { %3182 = vmatprep.subr.mxu0 %v3549_v0 }
 0x309   : > { %v1491_v3 = vpop.f32.mrf.mxu0 }
 0x30a   : > { %v1580_v5 = vpop.f32.mrf.mxu1 }
 0x30b   : > { %v1493_v4 = vpop.f32.mrf.mxu0  ;;  %v1581_v18 = vadd.f32 %v1580_v5, %v1491_v3  ;;  %v2127_v3 = vld [vmem:[#allocation7 + $0x10] sm:$0xff]  ;;  %v2126_v5 = vld [vmem:[#allocation7 + $0x8] sm:$0xff] }
 0x30c   : > { %v1582_v7 = vpop.f32.mrf.mxu1  ;;  %3183 = vmatpush3.msra.mxu0 %v2127_v3  ;;  %v2653_v3 = vld [vmem:[%s4466_s11 + $0x38] sm:$0xff] }
 0x30d   : > { %v1583_v16 = vadd.f32 %v1582_v7, %v1493_v4  ;;  %v2138_v4 = vld [vmem:[#allocation7 + $0x58] sm:$0xff]  ;;  %3184 = vmatprep.subr.mxu0 %v3549_v0  ;;  %v2125_v7 = vld [vmem:[#allocation7] sm:$0xff] }
 0x30e   : > { %3185 = vmatpush3.msra.mxu0 %v2126_v5  ;;  %v2651_v5 = vld [vmem:[%s4466_s11 + $0x28] sm:$0xff] }
 0x30f   : > { %v1497_v6 = vpop.f32.mrf.mxu0  ;;  %3186 = vmatprep.subr.mxu0 %v3549_v0 }
 0x310   : > { %v1586_v10 = vpop.f32.mrf.mxu1  ;;  %3187 = vmatpush3.msra.mxu0 %v2125_v7  ;;  %v2649_v7 = vld [vmem:[%s4466_s11 + $0x18] sm:$0xff] }
 0x311   : > { %v1499_v8 = vpop.f32.mrf.mxu0  ;;  %v1587_v19 = vadd.f32 %v1586_v10, %v1497_v6  ;;  %v2137_v6 = vld [vmem:[#allocation7 + $0x50] sm:$0xff]  ;;  %3214 = vmatprep.subr.mxu0 %v3549_v0 }
 0x312   : > { %v1588_v12 = vpop.f32.mrf.mxu1 }
 0x313   : > { %v1589_v20 = vadd.f32 %v1588_v12, %v1499_v8 }
 0x322   : > { %v1694_v11 = vpop.f32.mrf.mxu0 }
 0x323   : > { %v1812_v14 = vpop.f32.mrf.mxu1  ;;  %v1705_v21 = vadd.f32 %v1694_v11, %v1581_v18  ;;  %v2304_v18 = vld [vmem:[#allocation7 + $0xe0] sm:$0xff] }
 0x324   : > { %v1696_v13 = vpop.f32.mrf.mxu0 }
 0x325   : > { %v1814_v17 = vpop.f32.mrf.mxu1  ;;  %v1706_v22 = vadd.f32 %v1696_v13, %v1583_v16  ;;  %v1823_v31 = vadd.f32 %v1812_v14, %v1705_v21  ;;  %v2305_v14 = vld [vmem:[#allocation7 + $0xe8] sm:$0xff]  ;;  %v2388_v21 = vld [vmem:[#allocation7 + $0x120] sm:$0xff] }
 0x327   : > { %v1700_v15 = vpop.f32.mrf.mxu0  ;;  %v1818_v25 = vpop.f32.mrf.mxu1  ;;  %v1824_v27 = vadd.f32 %v1814_v17, %v1706_v22  ;;  %v2303_v22 = vld [vmem:[#allocation7 + $0xd8] sm:$0xff] }
 0x328   : > { %v1707_v24 = vadd.f32 %v1700_v15, %v1587_v19  ;;  %v2391_v15 = vld [vmem:[#allocation7 + $0x138] sm:$0xff]  ;;  %v2390_v19 = vld [vmem:[#allocation7 + $0x130] sm:$0xff] }
 0x329   : > { %v1702_v23 = vpop.f32.mrf.mxu0  ;;  %v1820_v35 = vpop.f32.mrf.mxu1 }
 0x32a   : > { %v1708_v28 = vadd.f32 %v1702_v23, %v1589_v20  ;;  %v1825_v32 = vadd.f32 %v1818_v25, %v1707_v24  ;;  %v2389_v23 = vld [vmem:[#allocation7 + $0x128] sm:$0xff]  ;;  %v2302_v20 = vld [vmem:[#allocation7 + $0xd0] sm:$0xff]  ;;  %v2387_v25 = vld [vmem:[#allocation7 + $0x118] sm:$0xff] }
 0x32b   : > { %v2301_v24 = vld [vmem:[#allocation7 + $0xc8] sm:$0xff] }
 0x32c   : > { %v1826_v37 = vadd.f32 %v1820_v35, %v1708_v28  ;;  %v2299_v28 = vld [vmem:[#allocation7 + $0xb8] sm:$0xff]  ;;  %v2382_v35 = vld [vmem:[#allocation7 + $0xf0] sm:$0xff] }
 0x33a   : > { %v1930_v26 = vpop.f32.mrf.mxu0 }
 0x33b   : > { %v1941_v38 = vadd.f32 %v1930_v26, %v1823_v31  ;;  %v2300_v26 = vld [vmem:[#allocation7 + $0xc0] sm:$0xff] }
 0x33c   : > { %v1932_v30 = vpop.f32.mrf.mxu0  ;;  %v2384_v31 = vld [vmem:[#allocation7 + $0x100] sm:$0xff] }
 0x33d   : > { %v1942_v33 = vadd.f32 %v1932_v30, %v1824_v27  ;;  %v1957_v46 = vadd.f32 %v1950_v40, %v1941_v38  ;;  %v2386_v27 = vld [vmem:[#allocation7 + $0x110] sm:$0xff]  ;;  %v2477_v38 = vld [vmem:[#allocation7 + $0x188] sm:$0xff] }
 0x33e   : > { %v1936_v36 = vpop.f32.mrf.mxu0  ;;  %v2298_v30 = vld [vmem:[#allocation7 + $0xb0] sm:$0xff] }
 0x33f   : > { %v1943_v41 = vadd.f32 %v1936_v36, %v1825_v32  ;;  %v1958_v43 = vadd.f32 %v1954_v34, %v1942_v33  ;;  %v1961_v39 = vmax.f32 %v1957_v46, 0.0  ;;  %v2297_v32 = vld [vmem:[#allocation7 + $0xa8] sm:$0xff]  ;;  %v2383_v33 = vld [vmem:[#allocation7 + $0xf8] sm:$0xff]  ;;  %v2470_v46 = vld [vmem:[#allocation7 + $0x150] sm:$0xff] }
 0x340   : > { %v1938_v42 = vpop.f32.mrf.mxu0 }
 0x341   : > { %v1959_v44 = vadd.f32 %v1950_v40, %v1943_v41  ;;  %v1944_v45 = vadd.f32 %v1938_v42, %v1826_v37  ;;  %v1962_v48 = vmax.f32 %v1958_v43, 0.0  ;;  %v2476_v40 = vld [vmem:[#allocation7 + $0x180] sm:$0xff]  ;;  %v2475_v41 = vld [vmem:[#allocation7 + $0x178] sm:$0xff]  ;;  %v2474_v42 = vld [vmem:[#allocation7 + $0x170] sm:$0xff] }
 0x342   : > { %v2473_v43 = vld [vmem:[#allocation7 + $0x168] sm:$0xff] }
 0x343   : > { %v1960_v47 = vadd.f32 %v1954_v34, %v1944_v45  ;;  %v1963_v49 = vmax.f32 %v1959_v44, 0.0  ;;  %v1965_v53 = vmax.f32 %v1961_v39, %v1962_v48  ;;  %v2296_v34 = vld [vmem:[#allocation7 + $0xa0] sm:$0xff]  ;;  %v2471_v45 = vld [vmem:[#allocation7 + $0x158] sm:$0xff] }
 0x344   : > { %v2472_v44 = vld [vmem:[#allocation7 + $0x160] sm:$0xff] }
 0x345   : > { %v1964_v51 = vmax.f32 %v1960_v47, 0.0  ;;  %v2469_v47 = vld [vmem:[#allocation7 + $0x148] sm:$0xff]  ;;  %v2468_v48 = vld [vmem:[#allocation7 + $0x140] sm:$0xff] }
 0x346   : > { %v2568_v39 = vld [vmem:[%s4464_s9 + $0x68] sm:$0xff] }
 0x347   : > { %v1966_v9 = vmax.f32 %v1963_v49, %v1964_v51  ;;  %v2569_v51 = vld [vmem:[%s4464_s9 + $0x70] sm:$0xff] }
 0x349   : > { %3132 = vmatpush3.msk.msra.mxu1 %vm1972_vm6, %v1966_v9 }
 0x34a   : > { %3133 = vmatprep.subr.mxu1 %v3549_v0 }
 0x34b   : > { %3134 = vmatpush3.msra.mxu1 %v1965_v53 }
 0x34c   : > { %3136 = vmatmul.mubr.msk.f32.vlgmr.msra.gmra.mxu1 %vm1968_vm7, %v1967_v52  ;;  %3138 = vmatprep.subr.mxu1 %v3549_v0  ;;  %v2565_v52 = vld [vmem:[%s4464_s9 + $0x50] sm:$0xff] }
 0x34d   : > { %3139 = vmatpush3.msk.msra.mxu1 %vm1972_vm6, %v1966_v9  ;;  %3142 = vmatprep.mubr.msk.f32.mxu1 %vm3550_vm5, %v3549_v0  ;;  %v2567_v9 = vld [vmem:[%s4464_s9 + $0x60] sm:$0xff] }
 0x34e   : > { %3140 = vmatprep.subr.mxu1 %v3549_v0 }
 0x34f   : > { %3141 = vmatpush3.msra.mxu1 %v1965_v53  ;;  %v2566_v53 = vld [vmem:[%s4464_s9 + $0x58] sm:$0xff] }
 0x350   : > { %3143 = vmatmul.mubr.msk.f32.vlgmr.msra.gmra.mxu1 %vm1968_vm7, %v2993_v63  ;;  %3145 = vmatprep.subr.mxu1 %v3549_v0  ;;  %v2564_v63 = vld [vmem:[%s4464_s9 + $0x48] sm:$0xff] }
 0x351   : > { %3146 = vmatpush3.msra.mxu1 %v2146_v54  ;;  %3165 = vmatprep.mubr.msk.f32.mxu1 %vm3550_vm5, %v3549_v0  ;;  %v2563_v54 = vld [vmem:[%s4464_s9 + $0x40] sm:$0xff] }
 0x352   : > { %3147 = vmatprep.subr.mxu1 %v3549_v0 }
 0x353   : > { %3148 = vmatpush3.msra.mxu1 %v2145_v50  ;;  %v2562_v50 = vld [vmem:[%s4464_s9 + $0x38] sm:$0xff] }
 0x354   : > { %3149 = vmatprep.subr.mxu1 %v3549_v0 }
 0x355   : > { %3150 = vmatpush3.msra.mxu1 %v2144_v55  ;;  %v2561_v55 = vld [vmem:[%s4464_s9 + $0x30] sm:$0xff] }
 0x356   : > { %3151 = vmatprep.subr.mxu1 %v3549_v0 }
 0x357   : > { %3152 = vmatpush3.msra.mxu1 %v2143_v56  ;;  %v2560_v56 = vld [vmem:[%s4464_s9 + $0x28] sm:$0xff] }
 0x358   : > { %3153 = vmatprep.subr.mxu1 %v3549_v0 }
 0x359   : > { %3154 = vmatpush3.msra.mxu1 %v2142_v58  ;;  %v2558_v58 = vld [vmem:[%s4464_s9 + $0x18] sm:$0xff] }
 0x35a   : > { %3155 = vmatprep.subr.mxu1 %v3549_v0 }
 0x35b   : > { %3156 = vmatpush3.msra.mxu1 %v2141_v60  ;;  %v2556_v60 = vld [vmem:[%s4464_s9 + $0x8] sm:$0xff] }
 0x35c   : > { %3157 = vmatprep.subr.mxu1 %v3549_v0 }
 0x35d   : > { %3158 = vmatpush3.msra.mxu1 %v2140_v62  ;;  %v2656_v62 = vld [vmem:[%s4466_s11 + $0x50] sm:$0xf] }
 0x35e   : > { %3159 = vmatprep.subr.mxu1 %v3549_v0 }
 0x35f   : > { %3160 = vmatpush3.msra.mxu1 %v2139_v2  ;;  %v2654_v2 = vld [vmem:[%s4466_s11 + $0x40] sm:$0xff] }
 0x360   : > { %3161 = vmatprep.subr.mxu1 %v3549_v0 }
 0x361   : > { %3162 = vmatpush3.msra.mxu1 %v2138_v4  ;;  %v2652_v4 = vld [vmem:[%s4466_s11 + $0x30] sm:$0xff] }
 0x362   : > { %3163 = vmatprep.subr.mxu1 %v3549_v0 }
 0x363   : > { %3164 = vmatpush3.msra.mxu1 %v2137_v6  ;;  %v2650_v6 = vld [vmem:[%s4466_s11 + $0x20] sm:$0xff] }
 0x364   : > { %3191 = vmatprep.subr.mxu1 %v3549_v0 }
 0x40c   : > { %v2042_v8 = vpop.f32.mrf.mxu1 }
 0x40e   : > { %v3137_v10 = vpop.f32.mrf.mxu1 }
 0x410   : > { %v2117_v11 = vpop.f32.mrf.mxu1 }
 0x411   : > { %v2121_v12 = vmax.f32 %v2042_v8, %v2117_v11 }
 0x412   : > { %v3144_v13 = vpop.f32.mrf.mxu1 }
 0x413   : > { %2123 = vst.msk [vmem:[#allocation3] sm:$0x1f] %vm2122_vm8, %v2121_v12 }
 0x41a   : > { %v2135_v16 = vld [vmem:[#allocation3 + $0x1] sm:$0x1]  ;;  %v2124_v17 = vld [vmem:[#allocation3] sm:$0x1]  ;;  %v2294_v36 = vld [vmem:[#allocation3 + $0x2] sm:$0x1] }
 0x41b   : > { %3166 = vmatmul.mubr.msk.f32.vlgmr.msra.gmra.mxu1 %vm2147_vm9, %v2135_v16  ;;  %3189 = vmatmul.mubr.msk.f32.vlgmr.msra.gmra.mxu0 %vm2147_vm9, %v2124_v17  ;;  %v2380_v37 = vld [vmem:[#allocation3 + $0x3] sm:$0x1]  ;;  %v2466_v49 = vld [vmem:[#allocation3 + $0x4] sm:$0x1] }
 0x41c   : > { %3192 = vmatpush3.msra.mxu1 %v2305_v14  ;;  %3215 = vmatpush3.msra.mxu0 %v2391_v15 }
 0x41d   : > { %3193 = vmatprep.subr.mxu1 %v3549_v0  ;;  %3216 = vmatprep.subr.mxu0 %v3549_v0 }
 0x41e   : > { %3194 = vmatpush3.msra.mxu1 %v2304_v18  ;;  %3217 = vmatpush3.msra.mxu0 %v2390_v19 }
 0x41f   : > { %3195 = vmatprep.subr.mxu1 %v3549_v0  ;;  %3218 = vmatprep.subr.mxu0 %v3549_v0 }
 0x420   : > { %3196 = vmatpush3.msra.mxu1 %v2303_v22  ;;  %3219 = vmatpush3.msra.mxu0 %v2389_v23  ;;  %v2552_v23 = vld [vmem:[%s4463_s8] sm:$0x1] }
 0x421   : > { %3197 = vmatprep.subr.mxu1 %v3549_v0  ;;  %3220 = vmatprep.subr.mxu0 %v3549_v0 }
 0x422   : > { %3198 = vmatpush3.msra.mxu1 %v2302_v20  ;;  %3221 = vmatpush3.msra.mxu0 %v2388_v21 }
 0x423   : > { %3199 = vmatprep.subr.mxu1 %v3549_v0  ;;  %3222 = vmatprep.subr.mxu0 %v3549_v0 }
 0x424   : > { %3200 = vmatpush3.msra.mxu1 %v2301_v24  ;;  %3223 = vmatpush3.msra.mxu0 %v2387_v25 }
 0x425   : > { %3201 = vmatprep.subr.mxu1 %v3549_v0  ;;  %3224 = vmatprep.subr.mxu0 %v3549_v0 }
 0x426   : > { %3202 = vmatpush3.msra.mxu1 %v2300_v26  ;;  %3225 = vmatpush3.msra.mxu0 %v2386_v27  ;;  %v2648_v26 = vld [vmem:[%s4466_s11 + $0x10] sm:$0xff]  ;;  %v2647_v27 = vld [vmem:[%s4466_s11 + $0x8] sm:$0xff] }
 0x427   : > { %3203 = vmatprep.subr.mxu1 %v3549_v0  ;;  %3226 = vmatprep.subr.mxu0 %v3549_v0 }
 0x428   : > { %3204 = vmatpush3.msra.mxu1 %v2299_v28  ;;  %3227 = vmatpush3.msra.mxu0 %v2385_v29  ;;  %v2646_v28 = vld [vmem:[%s4466_s11] sm:$0xff] }
 0x429   : > { %3205 = vmatprep.subr.mxu1 %v3549_v0  ;;  %3228 = vmatprep.subr.mxu0 %v3549_v0  ;;  %v2570_v29 = vld [vmem:[%s4465_s10] sm:$0x1] }
 0x42a   : > { %3206 = vmatpush3.msra.mxu1 %v2298_v30  ;;  %3229 = vmatpush3.msra.mxu0 %v2384_v31 }
 0x42b   : > { %3207 = vmatprep.subr.mxu1 %v3549_v0  ;;  %3230 = vmatprep.subr.mxu0 %v3549_v0 }
 0x42c   : > { %3208 = vmatpush3.msra.mxu1 %v2297_v32  ;;  %3231 = vmatpush3.msra.mxu0 %v2383_v33 }
 0x42d   : > { %3209 = vmatprep.subr.mxu1 %v3549_v0  ;;  %3232 = vmatprep.subr.mxu0 %v3549_v0 }
 0x42e   : > { %3210 = vmatpush3.msra.mxu1 %v2296_v34  ;;  %3211 = vmatprep.mubr.msk.f32.mxu1 %vm3550_vm5, %v3549_v0  ;;  %v2657_v34 = vld [vmem:[#allocation9] sm:$0x1] }
 0x42f   : > { %3233 = vmatpush3.msra.mxu0 %v2382_v35  ;;  %3234 = vmatprep.mubr.msk.f32.mxu0 %vm3550_vm5, %v3549_v0 }
 0x430   : > { %3212 = vmatmul.mubr.msk.f32.vlgmr.msra.gmra.mxu1 %vm2147_vm9, %v2294_v36  ;;  %3235 = vmatmul.mubr.msk.f32.vlgmr.msra.gmra.mxu0 %vm2147_vm9, %v2380_v37 }
 0x431   : > { %3237 = vmatprep.subr.mxu1 %v3549_v0  ;;  %3257 = vmatprep.mubr.msk.f32.mxu1 %vm3550_vm5, %v3549_v0 }
 0x432   : > { %3238 = vmatpush3.msra.mxu1 %v2477_v38  ;;  %3260 = vmatprep.subr.mxu0 %v3549_v0 }
 0x433   : > { %3239 = vmatprep.subr.mxu1 %v3549_v0  ;;  %3290 = vmatprep.mubr.msk.f32.mxu0 %vm3550_vm5, %v3549_v0 }
 0x434   : > { %3240 = vmatpush3.msra.mxu1 %v2476_v40  ;;  %3261 = vmatpush3.msra.mxu0 %v2569_v51 }
 0x435   : > { %3241 = vmatprep.subr.mxu1 %v3549_v0  ;;  %3262 = vmatprep.subr.mxu0 %v3549_v0 }
 0x436   : > { %3242 = vmatpush3.msra.mxu1 %v2475_v41  ;;  %3263 = vmatpush3.msra.mxu0 %v2568_v39 }
 0x437   : > { %3243 = vmatprep.subr.mxu1 %v3549_v0  ;;  %3264 = vmatprep.subr.mxu0 %v3549_v0 }
 0x438   : > { %3244 = vmatpush3.msra.mxu1 %v2474_v42  ;;  %3265 = vmatpush3.msra.mxu0 %v2567_v9 }
 0x439   : > { %3245 = vmatprep.subr.mxu1 %v3549_v0  ;;  %3266 = vmatprep.subr.mxu0 %v3549_v0 }
 0x43a   : > { %3246 = vmatpush3.msra.mxu1 %v2473_v43  ;;  %3267 = vmatpush3.msra.mxu0 %v2566_v53 }
 0x43b   : > { %3247 = vmatprep.subr.mxu1 %v3549_v0  ;;  %3268 = vmatprep.subr.mxu0 %v3549_v0 }
 0x43c   : > { %3248 = vmatpush3.msra.mxu1 %v2472_v44  ;;  %3269 = vmatpush3.msra.mxu0 %v2565_v52 }
 0x43d   : > { %3249 = vmatprep.subr.mxu1 %v3549_v0  ;;  %3270 = vmatprep.subr.mxu0 %v3549_v0 }
 0x43e   : > { %3250 = vmatpush3.msra.mxu1 %v2471_v45  ;;  %3271 = vmatpush3.msra.mxu0 %v2564_v63 }
 0x43f   : > { %3251 = vmatprep.subr.mxu1 %v3549_v0  ;;  %3272 = vmatprep.subr.mxu0 %v3549_v0 }
 0x440   : > { %3252 = vmatpush3.msra.mxu1 %v2470_v46  ;;  %3273 = vmatpush3.msra.mxu0 %v2563_v54 }
 0x441   : > { %3253 = vmatprep.subr.mxu1 %v3549_v0  ;;  %3274 = vmatprep.subr.mxu0 %v3549_v0 }
 0x442   : > { %3254 = vmatpush3.msra.mxu1 %v2469_v47  ;;  %3275 = vmatpush3.msra.mxu0 %v2562_v50 }
 0x443   : > { %3255 = vmatprep.subr.mxu1 %v3549_v0  ;;  %3276 = vmatprep.subr.mxu0 %v3549_v0 }
 0x444   : > { %3256 = vmatpush3.msra.mxu1 %v2468_v48  ;;  %3277 = vmatpush3.msra.mxu0 %v2561_v55 }
 0x445   : > { %3258 = vmatmul.mubr.msk.f32.vlgmr.msra.gmra.mxu1 %vm2147_vm9, %v2466_v49  ;;  %3293 = vmatprep.subr.mxu1 %v3549_v0 }
 0x446   : > { %3315 = vmatprep.mubr.msk.f32.mxu1 %vm3550_vm5, %v3549_v0  ;;  %3278 = vmatprep.subr.mxu0 %v3549_v0 }
 0x447   : > { %3279 = vmatpush3.msra.mxu0 %v2560_v56  ;;  %3294 = vmatpush3.msk.msra.mxu1 %vm1195_vm2, %v2656_v62 }
 0x448   : > { %3280 = vmatprep.subr.mxu0 %v3549_v0  ;;  %3295 = vmatprep.subr.mxu1 %v3549_v0 }
 0x449   : > { %3281 = vmatpush3.msra.mxu0 %v2559_v57  ;;  %3296 = vmatpush3.msra.mxu1 %v2655_v1 }
 0x44a   : > { %3282 = vmatprep.subr.mxu0 %v3549_v0  ;;  %3297 = vmatprep.subr.mxu1 %v3549_v0 }
 0x44b   : > { %3283 = vmatpush3.msra.mxu0 %v2558_v58  ;;  %3298 = vmatpush3.msra.mxu1 %v2654_v2 }
 0x44c   : > { %3284 = vmatprep.subr.mxu0 %v3549_v0  ;;  %3299 = vmatprep.subr.mxu1 %v3549_v0 }
 0x44d   : > { %3285 = vmatpush3.msra.mxu0 %v2557_v59  ;;  %3300 = vmatpush3.msra.mxu1 %v2653_v3 }
 0x44e   : > { %3286 = vmatprep.subr.mxu0 %v3549_v0  ;;  %3301 = vmatprep.subr.mxu1 %v3549_v0 }
 0x44f   : > { %3287 = vmatpush3.msra.mxu0 %v2556_v60  ;;  %3302 = vmatpush3.msra.mxu1 %v2652_v4 }
 0x450   : > { %3288 = vmatprep.subr.mxu0 %v3549_v0  ;;  %3303 = vmatprep.subr.mxu1 %v3549_v0 }
 0x451   : > { %3289 = vmatpush3.msra.mxu0 %v2555_v61  ;;  %3304 = vmatpush3.msra.mxu1 %v2651_v5 }
 0x452   : > { %3305 = vmatprep.subr.mxu1 %v3549_v0 }
 0x453   : > { %3306 = vmatpush3.msra.mxu1 %v2650_v6 }
 0x454   : > { %3307 = vmatprep.subr.mxu1 %v3549_v0 }
 0x455   : > { %3308 = vmatpush3.msra.mxu1 %v2649_v7 }
 0x456   : > { %3309 = vmatprep.subr.mxu1 %v3549_v0 }
 0x457   : > { %3310 = vmatpush3.msra.mxu1 %v2648_v26 }
 0x458   : > { %3311 = vmatprep.subr.mxu1 %v3549_v0 }
 0x459   : > { %3312 = vmatpush3.msra.mxu1 %v2647_v27 }
 0x45a   : > { %3313 = vmatprep.subr.mxu1 %v3549_v0 }
 0x45b   : > { %3314 = vmatpush3.msra.mxu1 %v2646_v28 }
 0x4db   : > { %v2217_v8 = vpop.f32.mrf.mxu1  ;;  %v2290_v10 = vpop.f32.mrf.mxu0 }
 0x4dc   : > { %v2291_v17 = vadd.f32 %v2290_v10, %v2217_v8 }
 0x4dd   : > { %v3167_v11 = vpop.f32.mrf.mxu1  ;;  %v3190_v12 = vpop.f32.mrf.mxu0 }
 0x4f0   : > { %v2375_v13 = vpop.f32.mrf.mxu1  ;;  %v2461_v14 = vpop.f32.mrf.mxu0 }
 0x4f1   : > { %v2379_v18 = vadd.f32 %v2375_v13, %v2291_v17 }
 0x4f2   : > { %v3213_v15 = vpop.f32.mrf.mxu1  ;;  %v3236_v16 = vpop.f32.mrf.mxu0 }
 0x4f3   : > { %v2465_v19 = vadd.f32 %v2461_v14, %v2379_v18 }
 0x505   : > { %v2547_v22 = vpop.f32.mrf.mxu1 }
 0x506   : > { %v2551_v20 = vadd.f32 %v2547_v22, %v2465_v19 }
 0x507   : > { %v3259_v21 = vpop.f32.mrf.mxu1 }
 0x508   : > { %v2553_v24 = vadd.f32 %v2552_v23, %v2551_v20 }
 0x50a   : > { %v2554_v25 = vmax.f32 %v2553_v24, 0.0 }
 0x50c   : > { %3291 = vmatmul.mubr.msk.f32.vlgmr.msra.gmra.mxu0 %vm2571_vm10, %v2554_v25 }
 0x5cc   : > { %v2641_v30 = vpop.f32.mrf.mxu0 }
 0x5cd   : > { %v2642_v31 = vadd.f32 %v2641_v30, %v2570_v29 }
 0x5ce   : > { %v3292_v32 = vpop.f32.mrf.mxu0 }
 0x5cf   : > { %v2645_v33 = vmax.f32 %v2642_v31, 0.0 }
 0x5d1   : > { %3316 = vmatmul.mubr.msk.f32.vlgmr.msra.gmra.mxu1 %vm1360_vm4, %v2645_v33 }
 0x691   : > { %v2730_v0 = vpop.f32.mrf.mxu1 }
 0x692   : > { %v2731_v35 = vadd.f32 %v2730_v0, %v2657_v34 }
 0x693   : > { %v3317_v36 = vpop.f32.mrf.mxu1 }
 0x694   : > { %2735 = vst.msk [vmem:[%s474_s16] sm:$0x1] %vm2734_vm11, %v2731_v35 }
 0x695   : > { %3485 = shalt.err (!%p3482_p11)
}
 0x696   : > { %s3486_s30 = scalar_lea.hbm %s4420_s21, 16  ;;  %s3490_s17 = scalar_lea.hbm %s4468_s13, 32 }
 0x697   : > { %p3487_p0 = scmp.ne.s32.totalorder %s4420_s21, %s3486_s30  ;;  %p3491_p3 = scmp.lt.s32.totalorder %s4420_s21, %s4468_s13 }
 0x698   : > { %p3492_p2 = scmp.lt.s32.totalorder %s3490_s17, %s3486_s30 }
 0x699   : > { %p3488_p1 = pnand %p3487_p0, %p3660_p5 }
 0x69a   : > { %p3493_p10 = por %p3492_p2, %p3491_p3 }
 0x69b   : > { %p3489_p13 = pneg %p3488_p1 }
 0x69d   : > { %p3494_p12 = pnand %p3493_p10, %p3489_p13 }
 0x69f   : > { %3497 = shalt.err (!%p3494_p12)
}
 0x6a0   : > { %3330 = dma.vmem_to_hbm [thread:$0]  (%p3660_p5), %s2750_s22, 16, %s4420_s21, %s2737_s25  }
 0x6a1 PF: > { %s4488_s27 = sld [smem:[#allocation14_spill]]  ;;  %p3352_p4 = scmp.ge.s32.totalorder %s3540_s28, 2 }
 0x6a2   : > { %s4489_s23 = sld [smem:[#allocation18_spill]] }
 0x6a7   : > { %s2761_s29 = sand.u32 1, %s4488_s27  }
 0x6a8   : > { %p4490_p7 = scmp.ne.s32.totalorder %s4489_s23, 0  ;;  %s2762_s19 = scalar_lea.sflag [#allocation6], %s2761_s29 }
 0x6aa   : > { %p3343_p6 = pnand %p3352_p4, %p4490_p7 }
 0x6ac   : > { %p3344_p9 = pneg %p3343_p6 }
 0x6ae   : > { %3523 = dma.done.wait (%p3344_p9), %s2762_s19, 16  }
 0x6af   : > { %3525 = vsyncadd (%p3344_p9), %s2762_s19, 4294967280  ;;  %s4491_s28 = sld [smem:[#allocation16_spill]]  ;;  %s4494_s25 = smov %s3532_s26 }
 0x6b0   : > { %s4492_s20 = sld [smem:[#allocation15_spill]] }
 0x6b1   : > { %s4493_s27 = sld [smem:[#allocation17_spill]] }
 0x6b5   : > { %p25_p8 = scmp.ge.s32.totalorder %s4491_s28, 4  }
 0x6b6   : > { %s4495_s26 = smov %s4492_s20 }
 0x6b7   :  { %27 = sbr.rel (!%p25_p8) target bundleno = 5 (0x5), region = 134 }
 0x6bc   :  { %2766 = vsyncpa [#allocation5], 1 }
 0x6bd   :  { %2768 = vsyncpa [#allocation5 + $0x1], 1 }
 0x6be   :  { %2769 = vsyncpa [#allocation8], 1 }
 0x6bf   :  { %2770 = vsyncpa [#allocation6], 1 }
 0x6c0   :  { %2772 = vsyncpa [#allocation6 + $0x1], 1 }

</bundles_post_ra>
